<compile_context>
chip_gen: v5e
topology: v5e:2x2
jax: 0.10.0
libtpu: 0.0.40
codegen_flags: <defaults>
</compile_context>

<pallas_src>
import jax
import jax.numpy as jnp
from jax.experimental import pallas as pl
from jax.experimental.pallas import tpu as pltpu


def _round_up(x, m):
    return ((x + m - 1) // m) * m


def cevi_kernel(u_ref, i_ref, tbl_ref, w1_ref, b1_ref,
                w2_ref, b2_ref, w3_ref, b3_ref, rating_ref, z_ref):
    tb = u_ref.shape[0]
    ui_rows = tbl_ref.shape[0]

    # ---- fused embedding gather + implicit concat (one-hot MXU matmul) ----
    # tbl is block-diagonal [[emb_user, 0], [0, emb_item]]; each one-hot row
    # has a 1 at `user` and a 1 at `user_num + item`, so oh @ tbl produces
    # cat([user_emb, item_emb], dim=-1) exactly.
    idx_u = u_ref[...]                                       # (tb, 1) int32
    idx_i = i_ref[...]                                       # (tb, 1) int32 (offset by user_num)
    col = jax.lax.broadcasted_iota(jnp.int32, (tb, ui_rows), 1)
    hit = jnp.logical_or(col == idx_u, col == idx_i)
    oh = jnp.where(hit, 1.0, 0.0).astype(jnp.bfloat16)       # (tb, ui_rows)

    emb_cat = jnp.dot(oh, tbl_ref[...],
                      preferred_element_type=jnp.float32)    # (tb, 2D) f32

    # ---- encode_user_item: Linear(2D->E) + ReLU, Linear(E->W) + Sigmoid ----
    h = jnp.dot(emb_cat.astype(jnp.bfloat16), w1_ref[...],
                preferred_element_type=jnp.float32) + b1_ref[...]
    h = jnp.maximum(h, 0.0)
    z = jax.nn.sigmoid(
        jnp.dot(h.astype(jnp.bfloat16), w2_ref[...],
                preferred_element_type=jnp.float32) + b2_ref[...])

    # ---- rating: Linear(W->1), emitted lane-dense as a (1, tb) row ----------
    r = jax.lax.dot_general(w3_ref[...], z, (((1,), (1,)), ((), ())),
                            preferred_element_type=jnp.float32) + b3_ref[0, 0]

    rating_ref[...] = r
    z_ref[...] = z


def prepare_params(params):
    """One-time (outside the hot path) weight repack: block-diag embedding
    table, bf16 MXU operands, lane padding of E and word_num (exact math)."""
    emb_user = params["emb_user"]
    emb_item = params["emb_item"]
    UN, D = emb_user.shape
    IN = emb_item.shape[0]
    w1, b1 = params["w1"], params["b1"]
    w2, b2 = params["w2"], params["b2"]
    w3, b3 = params["w3"], params["b3"]
    E = w1.shape[1]
    W = w2.shape[1]

    # Block-diagonal combined embedding table (rows padded to a sublane multiple).
    UI = _round_up(UN + IN, 8)
    tbl_cat = jnp.zeros((UI, 2 * D), jnp.float32)
    tbl_cat = tbl_cat.at[:UN, :D].set(emb_user)
    tbl_cat = tbl_cat.at[UN:UN + IN, D:].set(emb_item)

    # Lane-pad E and W (padded units: zero bias / zero weights -> exact).
    E_pad = _round_up(E, 128)
    W_pad = _round_up(W, 128)
    if E_pad != E:
        w1 = jnp.pad(w1, ((0, 0), (0, E_pad - E)))
        b1 = jnp.pad(b1, ((0, 0), (0, E_pad - E)))
        w2 = jnp.pad(w2, ((0, E_pad - E), (0, 0)))
    if W_pad != W:
        w2 = jnp.pad(w2, ((0, 0), (0, W_pad - W)))
        b2 = jnp.pad(b2, ((0, 0), (0, W_pad - W)))
        w3 = jnp.pad(w3, ((0, W_pad - W), (0, 0)))

    return {
        "tbl_cat": tbl_cat.astype(jnp.bfloat16),
        "w1": w1.astype(jnp.bfloat16),
        "b1": b1.astype(jnp.float32),
        "w2": w2.astype(jnp.bfloat16),
        "b2": b2.astype(jnp.float32),
        "w3_row": w3.reshape(1, W_pad).astype(jnp.float32),
        "b3": b3.reshape(1, 1).astype(jnp.float32),
        "user_num": UN,
        "item_num": IN,
        "word_num": W,
    }


def _choose_tile(B, block_b):
    """Batch tile: multiple of 128 (lane-dense rating row) with >=2 grid steps
    when possible (v7x: 2 TensorCores share the parallel axis)."""
    B8 = _round_up(max(B, 8), 8)
    if B8 < 256:
        return B8, B8                      # single full tile, blocks == array dims
    tb = min(_round_up(block_b, 128), _round_up(pl.cdiv(B8, 2), 128))
    return tb, _round_up(B8, tb)


def cevi_forward(user, item, prepared, *, block_b=1024):
    """Mirrors CEVI.forward(user, item) -> (rating_scores [B,1], z [B, word_num])."""
    UN = prepared["user_num"]
    W = prepared["word_num"]
    tbl_cat = prepared["tbl_cat"]
    UI, D2 = tbl_cat.shape
    E_pad = prepared["w1"].shape[1]
    W_pad = prepared["w2"].shape[1]

    B = user.shape[0]
    tb, B_pad = _choose_tile(B, block_b)
    grid = (B_pad // tb,)

    u_idx = user.astype(jnp.int32).reshape(B, 1)
    i_idx = item.astype(jnp.int32).reshape(B, 1) + UN       # shift into combined row axis
    if B_pad != B:
        u_idx = jnp.pad(u_idx, ((0, B_pad - B), (0, 0)))
        i_idx = jnp.pad(i_idx, ((0, B_pad - B), (0, 0)))

    rating_row, z = pl.pallas_call(
        cevi_kernel,
        grid=grid,
        in_specs=[
            # per-tile indices
            pl.BlockSpec((tb, 1), lambda i: (i, 0)),
            pl.BlockSpec((tb, 1), lambda i: (i, 0)),
            # weights / biases: constant block index -> VMEM resident across steps
            pl.BlockSpec((UI, D2), lambda i: (0, 0)),
            pl.BlockSpec((D2, E_pad), lambda i: (0, 0)),
            pl.BlockSpec((1, E_pad), lambda i: (0, 0)),
            pl.BlockSpec((E_pad, W_pad), lambda i: (0, 0)),
            pl.BlockSpec((1, W_pad), lambda i: (0, 0)),
            pl.BlockSpec((1, W_pad), lambda i: (0, 0)),
            # scalar bias in SMEM
            pl.BlockSpec(memory_space=pltpu.MemorySpace.SMEM),
        ],
        out_specs=(pl.BlockSpec((1, tb), lambda i: (0, i)),      # lane-dense rating row
                   pl.BlockSpec((tb, W_pad), lambda i: (i, 0))),
        out_shape=(jax.ShapeDtypeStruct((1, B_pad), jnp.float32),
                   jax.ShapeDtypeStruct((B_pad, W_pad), jnp.float32)),
        compiler_params=pltpu.CompilerParams(
            dimension_semantics=("parallel",)),
    )(u_idx, i_idx,
      tbl_cat, prepared["w1"], prepared["b1"],
      prepared["w2"], prepared["b2"], prepared["w3_row"], prepared["b3"])

    rating = rating_row.reshape(B_pad, 1)[:B]
    z = z[:B, :W]
    return rating, z


def init_params(key, *, user_num, item_num, ui_embedding_dim,
                encode_tensor_n, word_num):
    """Deterministic synthetic parameters matching CEVI.__init__ shapes."""
    ks = jax.random.split(key, 8)
    d2 = ui_embedding_dim * 2
    return {
        "emb_user": jax.random.normal(ks[0], (user_num, ui_embedding_dim), jnp.float32) * 0.1,
        "emb_item": jax.random.normal(ks[1], (item_num, ui_embedding_dim), jnp.float32) * 0.1,
        "w1": jax.random.normal(ks[2], (d2, encode_tensor_n), jnp.float32) * (1.0 / d2 ** 0.5),
        "b1": jax.random.normal(ks[3], (1, encode_tensor_n), jnp.float32) * 0.01,
        "w2": jax.random.normal(ks[4], (encode_tensor_n, word_num), jnp.float32) * (1.0 / encode_tensor_n ** 0.5),
        "b2": jax.random.normal(ks[5], (1, word_num), jnp.float32) * 0.01,
        "w3": jax.random.normal(ks[6], (word_num, 1), jnp.float32) * (1.0 / word_num ** 0.5),
        "b3": jax.random.normal(ks[7], (1, 1), jnp.float32) * 0.01,
    }


if __name__ == "__main__":
    B = 512                     # -> tb=256, grid of 2 parallel tiles (feeds both v7x TCs)
    user_num = 50
    item_num = 80
    ui_embedding_dim = 16
    encode_tensor_n = 32
    word_num = 128

    key = jax.random.PRNGKey(0)
    pkey, ukey, ikey = jax.random.split(key, 3)
    params = init_params(pkey,
                         user_num=user_num, item_num=item_num,
                         ui_embedding_dim=ui_embedding_dim,
                         encode_tensor_n=encode_tensor_n,
                         word_num=word_num)
    prepared = prepare_params(params)

    user = jax.random.randint(ukey, (B,), 0, user_num, dtype=jnp.int32)
    item = jax.random.randint(ikey, (B,), 0, item_num, dtype=jnp.int32)

    rating, z = cevi_forward(user, item, prepared)
    jax.block_until_ready((rating, z))

    # Pure-JAX reference mirroring the kernel's bf16 MXU-operand casts.
    bf, f32 = jnp.bfloat16, jnp.float32
    P = jax.lax.Precision.HIGHEST
    ue = params["emb_user"][user].astype(bf).astype(f32)
    ie = params["emb_item"][item].astype(bf).astype(f32)
    x = jnp.concatenate([ue, ie], axis=1)
    w1b = params["w1"].astype(bf).astype(f32)
    w2b = params["w2"].astype(bf).astype(f32)
    h_ref = jnp.maximum(jnp.dot(x, w1b, precision=P) + params["b1"], 0.0)
    z_ref = jax.nn.sigmoid(jnp.dot(h_ref.astype(bf).astype(f32), w2b, precision=P) + params["b2"])
    r_ref = jnp.dot(z_ref, params["w3"], precision=P) + params["b3"]

    assert rating.shape == (B, 1) and z.shape == (B, word_num)
    assert jnp.allclose(z, z_ref, atol=2e-3, rtol=2e-3)
    assert jnp.allclose(rating, r_ref, atol=1e-2, rtol=1e-2)

    print("KERNEL_OK")
</pallas_src>

<mosaic_0001>
module attributes {stable_mosaic.version = 11 : i64} {
  func.func @cevi_kernel(%arg0: i32, %arg1: memref<256x1xi32, #tpu.memory_space<vmem>>, %arg2: memref<256x1xi32, #tpu.memory_space<vmem>>, %arg3: memref<136x32xbf16, #tpu.memory_space<vmem>>, %arg4: memref<32x128xbf16, #tpu.memory_space<vmem>>, %arg5: memref<1x128xf32, #tpu.memory_space<vmem>>, %arg6: memref<128x128xbf16, #tpu.memory_space<vmem>>, %arg7: memref<1x128xf32, #tpu.memory_space<vmem>>, %arg8: memref<1x128xf32, #tpu.memory_space<vmem>>, %arg9: memref<1x1xf32, #tpu.memory_space<smem>>, %arg10: memref<1x256xf32, #tpu.memory_space<vmem>>, %arg11: memref<256x128xf32, #tpu.memory_space<vmem>>) attributes {dimension_semantics = [#tpu.dimension_semantics<parallel>], iteration_bounds = array<i64: 2>, scalar_prefetch = 0 : i64, scratch_operands = 0 : i64, tpu.core_type = #tpu.core_type<tc>, window_params = [{transform_indices = @transform_0, window_bounds = array<i64: 256, 1>}, {transform_indices = @transform_1, window_bounds = array<i64: 256, 1>}, {pipeline_mode = #tpu.pipeline_mode<synchronous>, transform_indices = @transform_2, window_bounds = array<i64: 136, 32>}, {pipeline_mode = #tpu.pipeline_mode<synchronous>, transform_indices = @transform_3, window_bounds = array<i64: 32, 128>}, {pipeline_mode = #tpu.pipeline_mode<synchronous>, transform_indices = @transform_4, window_bounds = array<i64: 1, 128>}, {pipeline_mode = #tpu.pipeline_mode<synchronous>, transform_indices = @transform_5, window_bounds = array<i64: 128, 128>}, {pipeline_mode = #tpu.pipeline_mode<synchronous>, transform_indices = @transform_6, window_bounds = array<i64: 1, 128>}, {pipeline_mode = #tpu.pipeline_mode<synchronous>, transform_indices = @transform_7, window_bounds = array<i64: 1, 128>}, {transform_indices = @transform_8, window_bounds = array<i64: 1, 1>}, {transform_indices = @transform_9, window_bounds = array<i64: 1, 256>}, {transform_indices = @transform_10, window_bounds = array<i64: 256, 128>}]} {
    %c0 = arith.constant 0 : index
    %c0_0 = arith.constant 0 : index
    %0 = vector.load %arg1[%c0, %c0_0] : memref<256x1xi32, #tpu.memory_space<vmem>>, vector<256x1xi32>
    %c0_1 = arith.constant 0 : index
    %c0_2 = arith.constant 0 : index
    %1 = vector.load %arg2[%c0_1, %c0_2] : memref<256x1xi32, #tpu.memory_space<vmem>>, vector<256x1xi32>
    %2 = tpu.iota {dimensions = array<i32: 1>} : vector<256x136xi32>
    %3 = vector.broadcast %0 : vector<256x1xi32> to vector<256x136xi32>
    %4 = arith.cmpi eq, %2, %3 : vector<256x136xi32>
    %5 = vector.broadcast %1 : vector<256x1xi32> to vector<256x136xi32>
    %6 = arith.cmpi eq, %2, %5 : vector<256x136xi32>
    %7 = arith.ori %4, %6 : vector<256x136xi1>
    %cst = arith.constant 1.000000e+00 : f32
    %cst_3 = arith.constant 0.000000e+00 : f32
    %8 = vector.broadcast %cst : f32 to vector<256x136xf32>
    %9 = vector.broadcast %cst_3 : f32 to vector<256x136xf32>
    %10 = arith.select %7, %8, %9 : vector<256x136xi1>, vector<256x136xf32>
    %11 = arith.truncf %10 : vector<256x136xf32> to vector<256x136xbf16>
    %c0_4 = arith.constant 0 : index
    %c0_5 = arith.constant 0 : index
    %12 = vector.load %arg3[%c0_4, %c0_5] : memref<136x32xbf16, #tpu.memory_space<vmem>>, vector<136x32xbf16>
    %cst_6 = arith.constant dense<0.000000e+00> : vector<256x32xf32>
    %13 = tpu.matmul %11, %12, %cst_6 {dimension_numbers = #tpu.dot_dimension_numbers<[1], [0], [0], [1], [0, 0, 1, 1], [], []>} : vector<256x136xbf16>, vector<136x32xbf16>, vector<256x32xf32> -> vector<256x32xf32>
    %14 = arith.truncf %13 : vector<256x32xf32> to vector<256x32xbf16>
    %c0_7 = arith.constant 0 : index
    %c0_8 = arith.constant 0 : index
    %15 = vector.load %arg4[%c0_7, %c0_8] : memref<32x128xbf16, #tpu.memory_space<vmem>>, vector<32x128xbf16>
    %cst_9 = arith.constant dense<0.000000e+00> : vector<256x128xf32>
    %16 = tpu.matmul %14, %15, %cst_9 {dimension_numbers = #tpu.dot_dimension_numbers<[1], [0], [0], [1], [0, 0, 1, 1], [], []>} : vector<256x32xbf16>, vector<32x128xbf16>, vector<256x128xf32> -> vector<256x128xf32>
    %c0_10 = arith.constant 0 : index
    %c0_11 = arith.constant 0 : index
    %17 = vector.load %arg5[%c0_10, %c0_11] : memref<1x128xf32, #tpu.memory_space<vmem>>, vector<1x128xf32>
    %18 = vector.broadcast %17 : vector<1x128xf32> to vector<256x128xf32>
    %19 = arith.addf %16, %18 : vector<256x128xf32>
    %cst_12 = arith.constant 0.000000e+00 : f32
    %20 = vector.broadcast %cst_12 : f32 to vector<256x128xf32>
    %21 = arith.maximumf %19, %20 : vector<256x128xf32>
    %22 = arith.truncf %21 : vector<256x128xf32> to vector<256x128xbf16>
    %c0_13 = arith.constant 0 : index
    %c0_14 = arith.constant 0 : index
    %23 = vector.load %arg6[%c0_13, %c0_14] : memref<128x128xbf16, #tpu.memory_space<vmem>>, vector<128x128xbf16>
    %cst_15 = arith.constant dense<0.000000e+00> : vector<256x128xf32>
    %24 = tpu.matmul %22, %23, %cst_15 {dimension_numbers = #tpu.dot_dimension_numbers<[1], [0], [0], [1], [0, 0, 1, 1], [], []>} : vector<256x128xbf16>, vector<128x128xbf16>, vector<256x128xf32> -> vector<256x128xf32>
    %c0_16 = arith.constant 0 : index
    %c0_17 = arith.constant 0 : index
    %25 = vector.load %arg7[%c0_16, %c0_17] : memref<1x128xf32, #tpu.memory_space<vmem>>, vector<1x128xf32>
    %26 = vector.broadcast %25 : vector<1x128xf32> to vector<256x128xf32>
    %27 = arith.addf %24, %26 : vector<256x128xf32>
    %28 = arith.negf %27 : vector<256x128xf32>
    %29 = math.exp %28 : vector<256x128xf32>
    %cst_18 = arith.constant 1.000000e+00 : f32
    %30 = vector.broadcast %cst_18 : f32 to vector<256x128xf32>
    %31 = arith.addf %30, %29 : vector<256x128xf32>
    %32 = arith.divf %30, %31 : vector<256x128xf32>
    %c0_19 = arith.constant 0 : index
    %c0_20 = arith.constant 0 : index
    %33 = vector.load %arg8[%c0_19, %c0_20] : memref<1x128xf32, #tpu.memory_space<vmem>>, vector<1x128xf32>
    %cst_21 = arith.constant dense<0.000000e+00> : vector<1x256xf32>
    %34 = tpu.matmul %33, %32, %cst_21 {dimension_numbers = #tpu.dot_dimension_numbers<[1], [1], [0], [0], [0, 0, 1, 0], [], []>} : vector<1x128xf32>, vector<256x128xf32>, vector<1x256xf32> -> vector<1x256xf32>
    %c0_22 = arith.constant 0 : index
    %c0_23 = arith.constant 0 : index
    %35 = memref.load %arg9[%c0_22, %c0_23] : memref<1x1xf32, #tpu.memory_space<smem>>
    %36 = vector.broadcast %35 : f32 to vector<1x256xf32>
    %37 = arith.addf %34, %36 : vector<1x256xf32>
    %c0_24 = arith.constant 0 : index
    %c0_25 = arith.constant 0 : index
    %38 = vector.load %arg10[%c0_24, %c0_25] : memref<1x256xf32, #tpu.memory_space<vmem>>, vector<1x256xf32>
    tpu.vector_store %arg10[%c0_24, %c0_25], %37 {strides = array<i32>} : memref<1x256xf32, #tpu.memory_space<vmem>>, vector<1x256xf32>,
    %c0_26 = arith.constant 0 : index
    %c0_27 = arith.constant 0 : index
    %39 = vector.load %arg11[%c0_26, %c0_27] : memref<256x128xf32, #tpu.memory_space<vmem>>, vector<256x128xf32>
    tpu.vector_store %arg11[%c0_26, %c0_27], %32 {strides = array<i32>} : memref<256x128xf32, #tpu.memory_space<vmem>>, vector<256x128xf32>,
    return
  }
  func.func @transform_0(%arg0: i32) -> (i32, i32) {
    %c0_i32 = arith.constant 0 : i32
    %c0_i32_0 = arith.constant 0 : i32
    return %arg0, %c0_i32 : i32, i32
  }
  func.func @transform_1(%arg0: i32) -> (i32, i32) {
    %c0_i32 = arith.constant 0 : i32
    %c0_i32_0 = arith.constant 0 : i32
    return %arg0, %c0_i32 : i32, i32
  }
  func.func @transform_2(%arg0: i32) -> (i32, i32) {
    %c0_i32 = arith.constant 0 : i32
    %c0_i32_0 = arith.constant 0 : i32
    %c0_i32_1 = arith.constant 0 : i32
    return %c0_i32, %c0_i32_0 : i32, i32
  }
  func.func @transform_3(%arg0: i32) -> (i32, i32) {
    %c0_i32 = arith.constant 0 : i32
    %c0_i32_0 = arith.constant 0 : i32
    %c0_i32_1 = arith.constant 0 : i32
    return %c0_i32, %c0_i32_0 : i32, i32
  }
  func.func @transform_4(%arg0: i32) -> (i32, i32) {
    %c0_i32 = arith.constant 0 : i32
    %c0_i32_0 = arith.constant 0 : i32
    %c0_i32_1 = arith.constant 0 : i32
    return %c0_i32, %c0_i32_0 : i32, i32
  }
  func.func @transform_5(%arg0: i32) -> (i32, i32) {
    %c0_i32 = arith.constant 0 : i32
    %c0_i32_0 = arith.constant 0 : i32
    %c0_i32_1 = arith.constant 0 : i32
    return %c0_i32, %c0_i32_0 : i32, i32
  }
  func.func @transform_6(%arg0: i32) -> (i32, i32) {
    %c0_i32 = arith.constant 0 : i32
    %c0_i32_0 = arith.constant 0 : i32
    %c0_i32_1 = arith.constant 0 : i32
    return %c0_i32, %c0_i32_0 : i32, i32
  }
  func.func @transform_7(%arg0: i32) -> (i32, i32) {
    %c0_i32 = arith.constant 0 : i32
    %c0_i32_0 = arith.constant 0 : i32
    %c0_i32_1 = arith.constant 0 : i32
    return %c0_i32, %c0_i32_0 : i32, i32
  }
  func.func @transform_8(%arg0: i32) -> (i32, i32) {
    %c0_i32 = arith.constant 0 : i32
    %c0_i32_0 = arith.constant 0 : i32
    %c0_i32_1 = arith.constant 0 : i32
    return %c0_i32, %c0_i32_0 : i32, i32
  }
  func.func @transform_9(%arg0: i32) -> (i32, i32) {
    %c0_i32 = arith.constant 0 : i32
    %c0_i32_0 = arith.constant 0 : i32
    return %c0_i32, %arg0 : i32, i32
  }
  func.func @transform_10(%arg0: i32) -> (i32, i32) {
    %c0_i32 = arith.constant 0 : i32
    %c0_i32_0 = arith.constant 0 : i32
    return %arg0, %c0_i32 : i32, i32
  }
}

</mosaic_0001>

<bundles_post_ra>
// kernel: tpu_custom_call.1
= control target key start
LH: loop header
LB: loop body
LE: loop exit
PB: predicated region body
PF: predicated region fallthrough
CT: control target
= control target key end

     0   :  { %s3670_s0 = inlined_call_operand.vmem [shape: s32[512,1], index: 0, kind: input, shape index: {}]   ;;  %s3671_s1 = inlined_call_operand.vmem [shape: s32[512,1], index: 1, kind: input, shape index: {}]   ;;  %s3672_s2 = inlined_call_operand.vmem [shape: bf16[136,32], index: 2, kind: input, shape index: {}]   ;;  %s3673_s3 = inlined_call_operand.vmem [shape: bf16[32,128], index: 3, kind: input, shape index: {}]   ;;  %s3674_s4 = inlined_call_operand.vmem [shape: f32[1,128], index: 4, kind: input, shape index: {}]   ;;  %s3675_s5 = inlined_call_operand.vmem [shape: bf16[128,128], index: 5, kind: input, shape index: {}]   ;;  %s3676_s6 = inlined_call_operand.vmem [shape: f32[1,128], index: 6, kind: input, shape index: {}]   ;;  %s3677_s7 = inlined_call_operand.vmem [shape: f32[1,128], index: 7, kind: input, shape index: {}]   ;;  %s3678_s8 = inlined_call_operand.<no memory space> [shape: f32[1,1], index: 8, kind: input, shape index: {}]   ;;  %s3679_s9 = inlined_call_operand.hbm [shape: f32[1,512], index: 9, kind: output, shape index: {0}]   ;;  %s3680_s10 = inlined_call_operand.hbm [shape: f32[512,128], index: 10, kind: output, shape index: {1}]  }
   0x1   :  { %3681 = sst [smem:[#allocation9_spill]] %s3670_s0 }
   0x2   :  { %3682 = sst [smem:[#allocation10_spill]] %s3671_s1 }
   0x3   :  { %3683 = sst [smem:[#allocation11_spill]] %s3672_s2 }
   0x4   :  { %3684 = sst [smem:[#allocation12_spill]] %s3673_s3 }
   0x5   :  { %16 = sst [smem:[#allocation2]] %s3678_s8 }
   0x6   :  { %17 = vsyncpa [#allocation4], 0 }
   0x7   :  { %19 = vsyncpa [#allocation4 + $0x1], 0 }
   0x8   :  { %20 = vsyncpa [#allocation6], 0 }
   0x9   :  { %22 = vsyncpa [#allocation6 + $0x1], 0  ;;  %s3005_s15 = smov 0   ;;  %s3007_s16 = smov 0  }
   0xa   :  { %s3009_s17 = smov 0   ;;  %s3011_s18 = smov 0  }
   0xb LB: > { %s3026_s8 = sadd.s32 4294967295, %s2940_s18   ;;  %s2458_s19 = sadd.s32 4294967294, %s2940_s18   ;;  %s2940_s18 = sphi %s3011_s18, %s3694_s18   ;;  %s2936_s17 = sphi %s3009_s17, %s3693_s17   ;;  %s2932_s16 = sphi %s3007_s16, %s3692_s16   ;;  %s2928_s15 = sphi %s3005_s15, %s3691_s15  }
   0xc   : > { %s3030_s20 = sadd.s32 1, %s2940_s18   ;;  %s234_s21 = sadd.s32 1, %s2936_s17 }
   0xd   : > { %s231_s22 = ssub.s32 %s2940_s18, %s3030_s20  ;;  %p244_p0 = scmp.ne.s32.totalorder %s2936_s17, %s2932_s16 }
   0xe   : > { %p232_p1 = scmp.eq.s32.totalorder %s231_s22, 0  ;;  %p245_p2 = scmp.eq.s32.totalorder %s3026_s8, 1 }
   0xf   : > { %p250_p3 = scmp.ne.s32.totalorder %s2932_s16, %s2928_s15  ;;  %p251_p4 = scmp.eq.s32.totalorder %s2458_s19, 1 }
  0x10   : > { %s3041_s23 = scalar_select %p232_p1, %s2936_s17, %s234_s21  }
  0x11   : > { %p3043_p5 = por %p245_p2, %p244_p0  ;;  %p3047_p6 = por %p251_p4, %p250_p3 }
  0x12   : > { %p2461_p7 = scmp.ge.s32.totalorder %s2940_s18, 1  ;;  %p334_p8 = scmp.lt.s32.totalorder %s2940_s18, 3 }
  0x14   : > { %p335_p9 = pnand %p2461_p7, %p334_p8 }
  0x15   : > { %s2464_s26 = sshll.u32 (!%p335_p9), %s3026_s8, 5  ;;  %s3687_s1 = sld [smem:[#allocation10_spill]] (!%p335_p9) }
  0x16   : > { %338 = sbr.rel (%p335_p9) target bundleno = 1058 (0x422), region = 56  ;;  %p383_p10 = scmp.lt.s32.totalorder (!%p335_p9), %s2464_s26, 63 }
  0x17   : > { %s3688_s0 = sld [smem:[#allocation9_spill]] (!%p335_p9)  ;;  %s2661_s22 = sshll.u32 (!%p335_p9), %s3026_s8, 8 }
  0x18   : > { %s3689_s2 = sld [smem:[#allocation11_spill]] (!%p335_p9)  ;;  %s2347_s29 = scalar_lea.hbm (!%p335_p9), %s3680_s10, %s2661_s22 }
  0x19   : > { %s3690_s3 = sld [smem:[#allocation12_spill]] (!%p335_p9) }
  0x1b   : > { %v2942_v0 = vmov 0   ;;  %s3696_s26 = smov (!%p383_p10, %s2464_s26), 63  ;;  %vm1061_vm0 = vcmask 1043456   ;;  %v461_v55 = vlaneseq  ;;  %vm1012_vm14 = vcmask 64512  }
  0x1c   : > { %2713 = vset.pattern.permute.xlu2 %v2942_v0  ;;  %2712 = vset.pattern.permute.xlu1 %v2942_v0  ;;  %s2465_s27 = sshll.u32 %s3696_s26, 3 }
  0x1d   : > { %2711 = vset.pattern.permute.xlu0 %v2942_v0  ;;  %s3057_s30 = scalar_lea.vmem %s3687_s1, %s2465_s27  ;;  %s3062_s13 = scalar_lea.vmem %s3688_s0, %s2465_s27  ;;  %v3137_v59 = vand.u32 127, %v461_v55 }
  0x1e   : > { %v429_v1 = vld [vmem:[%s3057_s30] sm:$0xff]  ;;  %v399_v2 = vld [vmem:[%s3062_s13 + $0x10] sm:$0xff]  ;;  %v430_v4 = vld [vmem:[%s3057_s30 + $0x8] sm:$0xff]  ;;  %s2866_s1 = scalar_lea.hbm %s3680_s10, 512 }
  0x1f   : > { %v397_v3 = vld [vmem:[%s3062_s13] sm:$0xff]  ;;  %625 = vperm.xlu1 %2712, %v429_v1   ;;  %471 = vperm.xlu2 %2713, %v399_v2   ;;  %v400_v5 = vld [vmem:[%s3062_s13 + $0x18] sm:$0xff]  ;;  %v398_v6 = vld [vmem:[%s3062_s13 + $0x8] sm:$0xff]  ;;  %v3140_v62 = vadd.s32 128, %v3137_v59 }
  0x20   : > { %465 = vperm.xlu0 %2711, %v397_v3   ;;  %v432_v7 = vld [vmem:[%s3057_s30 + $0x18] sm:$0xff]  ;;  %v401_v8 = vld [vmem:[%s3062_s13 + $0x20] sm:$0xff]  ;;  %v431_v9 = vld [vmem:[%s3057_s30 + $0x10] sm:$0xff] }
  0x21   : > { %v433_v10 = vld [vmem:[%s3057_s30 + $0x20] sm:$0xff]  ;;  %v434_v11 = vld [vmem:[%s3057_s30 + $0x28] sm:$0xff]  ;;  %v404_v13 = vld [vmem:[%s3062_s13 + $0x38] sm:$0xff] }
  0x22   : > { %v402_v12 = vld [vmem:[%s3062_s13 + $0x28] sm:$0xff]  ;;  %v435_v14 = vld [vmem:[%s3057_s30 + $0x30] sm:$0xff]  ;;  %v405_v16 = vld [vmem:[%s3062_s13 + $0x40] sm:$0xff] }
  0x23   : > { %v403_v15 = vld [vmem:[%s3062_s13 + $0x30] sm:$0xff]  ;;  %v406_v17 = vld [vmem:[%s3062_s13 + $0x48] sm:$0xff]  ;;  %v436_v18 = vld [vmem:[%s3057_s30 + $0x38] sm:$0xff] }
  0x24   : > { %v438_v19 = vld [vmem:[%s3057_s30 + $0x48] sm:$0xff]  ;;  %v407_v20 = vld [vmem:[%s3062_s13 + $0x50] sm:$0xff]  ;;  %v437_v21 = vld [vmem:[%s3057_s30 + $0x40] sm:$0xff] }
  0x25   : > { %v439_v22 = vld [vmem:[%s3057_s30 + $0x50] sm:$0xff]  ;;  %v440_v23 = vld [vmem:[%s3057_s30 + $0x58] sm:$0xff]  ;;  %v410_v26 = vld [vmem:[%s3062_s13 + $0x68] sm:$0xff] }
  0x26   : > { %v408_v24 = vld [vmem:[%s3062_s13 + $0x58] sm:$0xff]  ;;  %v441_v27 = vld [vmem:[%s3057_s30 + $0x60] sm:$0xff]  ;;  %v2649_v29 = vld [vmem:[%s3689_s2 + $0x30] sm:$0xff] }
  0x27   : > { %628 = vperm.xlu1 %2712, %v430_v4   ;;  %474 = vperm.xlu2 %2713, %v400_v5   ;;  %v2650_v25 = vld [vmem:[%s3689_s2 + $0x38] sm:$0xff]  ;;  %v409_v28 = vld [vmem:[%s3062_s13 + $0x60] sm:$0xff]  ;;  %v411_v30 = vld [vmem:[%s3062_s13 + $0x70] sm:$0xff] }
  0x28   : > { %468 = vperm.xlu0 %2711, %v398_v6   ;;  %1065 = vmatpush.bf16.msra.mxu0 %v2650_v25  ;;  %v412_v31 = vld [vmem:[%s3062_s13 + $0x78] sm:$0xff]  ;;  %v2648_v32 = vld [vmem:[%s3689_s2 + $0x28] sm:$0xff]  ;;  %v2647_v34 = vld [vmem:[%s3689_s2 + $0x20] sm:$0xff]  ;;  %v2943_v6 = vmov 0.0  }
  0x29   : > { %v442_v33 = vld [vmem:[%s3057_s30 + $0x68] sm:$0xff]  ;;  %v444_v35 = vld [vmem:[%s3057_s30 + $0x78] sm:$0xff]  ;;  %v413_v36 = vld [vmem:[%s3062_s13 + $0x80] sm:$0xff] }
  0x2a   : > { %v2646_v37 = vld [vmem:[%s3689_s2 + $0x18] sm:$0xff]  ;;  %v443_v38 = vld [vmem:[%s3057_s30 + $0x70] sm:$0xff]  ;;  %v445_v40 = vld [vmem:[%s3057_s30 + $0x80] sm:$0xff] }
  0x2b   : > { %v2645_v39 = vld [vmem:[%s3689_s2 + $0x10] sm:$0xff]  ;;  %v446_v41 = vld [vmem:[%s3057_s30 + $0x88] sm:$0xff]  ;;  %v960_v44 = vld [vmem:[%s3689_s2 + $0x40] sm:$0xf] }
  0x2c   : > { %1066 = vmatpush.bf16.msra.mxu0 %v2649_v29  ;;  %v414_v42 = vld [vmem:[%s3062_s13 + $0x88] sm:$0xff]  ;;  %v994_v45 = vunpack.c.l.b16 %v960_v44  ;;  %v2643_v46 = vld [vmem:[%s3689_s2] sm:$0xff]  ;;  %v416_v48 = vld [vmem:[%s3062_s13 + $0x98] sm:$0xff] }
  0x2d   : > { %v2644_v43 = vld [vmem:[%s3689_s2 + $0x8] sm:$0xff]  ;;  %v447_v49 = vld [vmem:[%s3057_s30 + $0x90] sm:$0xff]  ;;  %v417_v52 = vld [vmem:[%s3062_s13 + $0xa0] sm:$0xff] }
  0x2e   : > { %v1003_v47 = vpack.c.b16 %v994_v45, %v994_v45  ;;  %v415_v51 = vld [vmem:[%s3062_s13 + $0x90] sm:$0xff]  ;;  %v418_v53 = vld [vmem:[%s3062_s13 + $0xa8] sm:$0xff]  ;;  %v448_v54 = vld [vmem:[%s3057_s30 + $0x98] sm:$0xff] }
  0x2f   : > { %634 = vperm.xlu1 %2712, %v432_v7   ;;  %477 = vperm.xlu2 %2713, %v401_v8   ;;  %v450_v56 = vld [vmem:[%s3057_s30 + $0xa8] sm:$0xff]  ;;  %v419_v57 = vld [vmem:[%s3062_s13 + $0xb0] sm:$0xff]  ;;  %v449_v58 = vld [vmem:[%s3057_s30 + $0xa0] sm:$0xff] }
  0x30   : > { %631 = vperm.xlu0 %2711, %v431_v9   ;;  %1067 = vmatpush.bf16.msra.mxu0 %v2648_v32  ;;  %v1063_v50 = vsel %vm1061_vm0, %v1003_v47, 0  ;;  %v451_v63 = vld [vmem:[%s3057_s30 + $0xb0] sm:$0xff]  ;;  %v452_v0 = vld [vmem:[%s3057_s30 + $0xb8] sm:$0xff]  ;;  %v422_v5 = vld [vmem:[%s3062_s13 + $0xc8] sm:$0xff] }
  0x31   : > { %1161 = vmatpush.bf16.msra.mxu1 %v1063_v50  ;;  %v420_v1 = vld [vmem:[%s3062_s13 + $0xb8] sm:$0xff]  ;;  %v453_v9 = vld [vmem:[%s3057_s30 + $0xc0] sm:$0xff]  ;;  %v458_v29 = vld [vmem:[%s3057_s30 + $0xe8] sm:$0xff] }
  0x34   : > { %1068 = vmatpush.bf16.msra.mxu0 %v2647_v34 }
  0x37   : > { %637 = vperm.xlu1 %2712, %v433_v10   ;;  %640 = vperm.xlu2 %2713, %v434_v11   ;;  %v421_v10 = vld [vmem:[%s3062_s13 + $0xc0] sm:$0xff] }
  0x38   : > { %480 = vperm.xlu0 %2711, %v402_v12   ;;  %1069 = vmatpush.bf16.msra.mxu0 %v2646_v37  ;;  %v2944_v12 = vmov 1.0|1.0   ;;  %v427_v37 = vld [vmem:[%s3062_s13 + $0xf0] sm:$0xff] }
  0x3c   : > { %1070 = vmatpush.bf16.msra.mxu0 %v2645_v39 }
  0x3f   : > { %486 = vperm.xlu1 %2712, %v404_v13   ;;  %643 = vperm.xlu2 %2713, %v435_v14  }
  0x40   : > { %483 = vperm.xlu0 %2711, %v403_v15   ;;  %1071 = vmatpush.bf16.msra.mxu0 %v2644_v43 }
  0x44   : > { %1072 = vmatpush.bf16.msra.mxu0 %v2643_v46 }
  0x47   : > { %489 = vperm.xlu1 %2712, %v405_v16   ;;  %492 = vperm.xlu2 %2713, %v406_v17   ;;  %v423_v16 = vld [vmem:[%s3062_s13 + $0xd0] sm:$0xff]  ;;  %v424_v17 = vld [vmem:[%s3062_s13 + $0xd8] sm:$0xff] }
  0x48   : > { %646 = vperm.xlu0 %2711, %v436_v18   ;;  %v454_v18 = vld [vmem:[%s3057_s30 + $0xc8] sm:$0xff] }
  0x4f   : > { %652 = vperm.xlu1 %2712, %v438_v19   ;;  %495 = vperm.xlu2 %2713, %v407_v20  }
  0x50   : > { %649 = vperm.xlu0 %2711, %v437_v21   ;;  %v456_v21 = vld [vmem:[%s3057_s30 + $0xd8] sm:$0xff] }
  0x57   : > { %655 = vperm.xlu1 %2712, %v439_v22   ;;  %658 = vperm.xlu2 %2713, %v440_v23   ;;  %v425_v23 = vld [vmem:[%s3062_s13 + $0xe0] sm:$0xff] }
  0x58   : > { %498 = vperm.xlu0 %2711, %v408_v24   ;;  %v455_v24 = vld [vmem:[%s3057_s30 + $0xd0] sm:$0xff] }
  0x5f   : > { %504 = vperm.xlu1 %2712, %v410_v26   ;;  %661 = vperm.xlu2 %2713, %v441_v27  }
  0x60   : > { %501 = vperm.xlu0 %2711, %v409_v28   ;;  %v457_v28 = vld [vmem:[%s3057_s30 + $0xe0] sm:$0xff] }
  0x67   : > { %507 = vperm.xlu1 %2712, %v411_v30   ;;  %510 = vperm.xlu2 %2713, %v412_v31   ;;  %v426_v30 = vld [vmem:[%s3062_s13 + $0xe8] sm:$0xff] }
  0x68   : > { %664 = vperm.xlu0 %2711, %v442_v33  }
  0x6f   : > { %670 = vperm.xlu1 %2712, %v444_v35   ;;  %513 = vperm.xlu2 %2713, %v413_v36   ;;  %v428_v35 = vld [vmem:[%s3062_s13 + $0xf8] sm:$0xff]  ;;  %v459_v36 = vld [vmem:[%s3057_s30 + $0xf0] sm:$0xff] }
  0x70   : > { %667 = vperm.xlu0 %2711, %v443_v38  }
  0x77   : > { %673 = vperm.xlu1 %2712, %v445_v40   ;;  %676 = vperm.xlu2 %2713, %v446_v41   ;;  %v460_v41 = vld [vmem:[%s3057_s30 + $0xf8] sm:$0xff]  ;;  %s3435_s30 = sand.u32 1, %s2932_s16  }
  0x78   : > { %516 = vperm.xlu0 %2711, %v414_v42   ;;  %s2463_s13 = sshll.u32 %s3435_s30, 8  ;;  %s2322_s12 = scalar_lea.sflag [#allocation6], %s3435_s30 }
  0x79   : > { %v472_v2 = vpop.permute.xlu2 %471  ;;  %s3439_s11 = scalar_lea.vmem [#allocation5], %s2463_s13  ;;  %s2350_s13 = sshll.u32 %s2347_s29, 4  ;;  %s2351_s13 = int_to_ptr.hbm [resolvable:$true] %s2350_s13 }
  0x7a   : > { %s2348_s26 = sshll.u32 %s3439_s11, 4  ;;  %s2860_s14 = sshra.s32 %s2351_s13, 4  ;;  %s2349_s26 = int_to_ptr.vmem [resolvable:$true] %s2348_s26  ;;  %s2861_s14 = int_to_ptr.hbm [resolvable:$true] %s2860_s14 }
  0x7b   : > { %s2862_s19 = scalar_lea.hbm %s2861_s14, 256  ;;  %p2867_p0 = scmp.lt.s32.totalorder %s2861_s14, %s3680_s10 }
  0x7c   : > { %p2863_p11 = scmp.ne.s32.totalorder %s2861_s14, %s2862_s19  ;;  %p2868_p1 = scmp.lt.s32.totalorder %s2866_s1, %s2862_s19 }
  0x7e   : > { %p2864_p12 = pnand %p2863_p11, %p3043_p5  ;;  %p2869_p2 = por %p2868_p1, %p2867_p0 }
  0x7f   : > { %522 = vperm.xlu1 %2712, %v416_v48   ;;  %679 = vperm.xlu2 %2713, %v447_v49  }
  0x80   : > { %519 = vperm.xlu0 %2711, %v415_v51   ;;  %p2865_p13 = pneg %p2864_p12 }
  0x81   : > { %v475_v14 = vpop.permute.xlu2 %474 }
  0x82   : > { %vm567_vm15 = vcmp.eq.s32.totalorder %v3140_v62, %v475_v14  ;;  %p2870_p3 = pnand %p2869_p2, %p2865_p13 }
  0x87   : > { %525 = vperm.xlu1 %2712, %v417_v52   ;;  %528 = vperm.xlu2 %2713, %v418_v53  }
  0x88   : > { %682 = vperm.xlu0 %2711, %v448_v54  }
  0x89   : > { %v478_v22 = vpop.permute.xlu2 %477 }
  0x8f   : > { %688 = vperm.xlu1 %2712, %v450_v56   ;;  %531 = vperm.xlu2 %2713, %v419_v57  }
  0x90   : > { %685 = vperm.xlu0 %2711, %v449_v58  }
  0x91   : > { %v626_v60 = vpop.permute.xlu1 %625  ;;  %v641_v31 = vpop.permute.xlu2 %640 }
  0x92   : > { %v466_v61 = vpop.permute.xlu0 %465  ;;  %vm721_vm1 = vcmp.eq.s32.totalorder %v3140_v62, %v626_v60  ;;  %vm720_vm3 = vcmp.eq.s32.totalorder %v3137_v59, %v626_v60 }
  0x93   : > { %vm561_vm2 = vcmp.eq.s32.totalorder %v3140_v62, %v466_v61  ;;  %vm560_vm4 = vcmp.eq.s32.totalorder %v3137_v59, %v466_v61 }
  0x94   : > { %vm785_vm5 = vmor %vm561_vm2, %vm721_vm1  ;;  %vm565_vm1 = vcmp.eq.s32.totalorder %v3140_v62, %v472_v2 }
  0x95   : > { %vm784_vm10 = vmor %vm560_vm4, %vm720_vm3  ;;  %v849_v7 = vsel %vm785_vm5, 1.0, %v2943_v6  ;;  %vm564_vm3 = vcmp.eq.s32.totalorder %v3137_v59, %v472_v2  ;;  %vm566_vm5 = vcmp.eq.s32.totalorder %v3137_v59, %v475_v14 }
  0x97   : > { %691 = vperm.xlu1 %2712, %v451_v63   ;;  %694 = vperm.xlu2 %2713, %v452_v0  }
  0x98   : > { %534 = vperm.xlu0 %2711, %v420_v1  }
  0x99   : > { %v629_v3 = vpop.permute.xlu1 %628  ;;  %v644_v42 = vpop.permute.xlu2 %643 }
  0x9a   : > { %vm722_vm6 = vcmp.eq.s32.totalorder %v3137_v59, %v629_v3  ;;  %vm723_vm7 = vcmp.eq.s32.totalorder %v3140_v62, %v629_v3  ;;  %v469_v4 = vpop.permute.xlu0 %468 }
  0x9b   : > { %vm562_vm8 = vcmp.eq.s32.totalorder %v3137_v59, %v469_v4  ;;  %vm563_vm9 = vcmp.eq.s32.totalorder %v3140_v62, %v469_v4 }
  0x9c   : > { %vm787_vm11 = vmor %vm563_vm9, %vm723_vm7 }
  0x9d   : > { %v851_v8 = vsel %vm787_vm11, 1.0, %v2943_v6  ;;  %vm786_vm12 = vmor %vm562_vm8, %vm722_vm6 }
  0x9e   : > { %vm2500_vm13 = vmpackc.low %vm786_vm12, %vm784_vm10  ;;  %v913_v11 = vpack.c.bf16 %v851_v8, %v849_v7 }
  0x9f   : > { %2501 = vmatmul.msk.bf16.vlgmr.msra.gmra.mxu0 %vm2500_vm13, %v2944_v12  ;;  %540 = vperm.xlu1 %2712, %v422_v5  }
  0xa0   : > { %697 = vperm.xlu2 %2713, %v453_v9   ;;  %537 = vperm.xlu0 %2711, %v421_v10  }
  0xa1   : > { %2532 = vmatmul.msk.bf16.vlgmr.msra.gmra.mxu1 %vm1012_vm14, %v913_v11  ;;  %v635_v13 = vpop.permute.xlu1 %634  ;;  %v493_v47 = vpop.permute.xlu2 %492  ;;  %v2652_v11 = vld [vmem:[%s3690_s3 + $0x8] sm:$0xff] }
  0xa2   : > { %v632_v15 = vpop.permute.xlu0 %631  ;;  %vm727_vm0 = vcmp.eq.s32.totalorder %v3140_v62, %v635_v13  ;;  %vm726_vm6 = vcmp.eq.s32.totalorder %v3137_v59, %v635_v13  ;;  %1334 = vmatpush.bf16.msra.mxu2 %v2652_v11  ;;  %v2651_v13 = vld [vmem:[%s3690_s3] sm:$0xff] }
  0xa3   : > { %vm725_vm2 = vcmp.eq.s32.totalorder %v3140_v62, %v632_v15  ;;  %vm724_vm4 = vcmp.eq.s32.totalorder %v3137_v59, %v632_v15  ;;  %vm791_vm7 = vmor %vm567_vm15, %vm727_vm0  ;;  %vm569_vm15 = vcmp.eq.s32.totalorder %v3140_v62, %v478_v22 }
  0xa4   : > { %vm789_vm8 = vmor %vm565_vm1, %vm725_vm2  ;;  %v855_v19 = vsel %vm791_vm7, 1.0, %v2943_v6  ;;  %vm731_vm1 = vcmp.eq.s32.totalorder %v3140_v62, %v641_v31 }
  0xa5   : > { %vm788_vm9 = vmor %vm564_vm3, %vm724_vm4  ;;  %v853_v20 = vsel %vm789_vm8, 1.0, %v2943_v6  ;;  %vm568_vm4 = vcmp.eq.s32.totalorder %v3137_v59, %v478_v22 }
  0xa6   : > { %vm790_vm10 = vmor %vm566_vm5, %vm726_vm6  ;;  %v915_v26 = vpack.c.bf16 %v855_v19, %v853_v20  ;;  %vm730_vm6 = vcmp.eq.s32.totalorder %v3137_v59, %v641_v31  ;;  %1335 = vmatpush.bf16.msra.mxu2 %v2651_v13 }
  0xa7   : > { %543 = vperm.xlu1 %2712, %v423_v16   ;;  %vm2502_vm11 = vmpackc.low %vm790_vm10, %vm788_vm9 }
  0xa8   : > { %546 = vperm.xlu2 %2713, %v424_v17   ;;  %700 = vperm.xlu0 %2711, %v454_v18  }
  0xa9   : > { %v638_v27 = vpop.permute.xlu1 %637  ;;  %v496_v50 = vpop.permute.xlu2 %495 }
  0xaa   : > { %v481_v25 = vpop.permute.xlu0 %480  ;;  %vm729_vm12 = vcmp.eq.s32.totalorder %v3140_v62, %v638_v27  ;;  %vm728_vm0 = vcmp.eq.s32.totalorder %v3137_v59, %v638_v27 }
  0xab   : > { %vm571_vm13 = vcmp.eq.s32.totalorder %v3140_v62, %v481_v25  ;;  %vm793_vm2 = vmor %vm569_vm15, %vm729_vm12  ;;  %vm570_vm3 = vcmp.eq.s32.totalorder %v3137_v59, %v481_v25  ;;  %vm733_vm15 = vcmp.eq.s32.totalorder %v3140_v62, %v644_v42 }
  0xac   : > { %vm795_vm5 = vmor %vm571_vm13, %vm731_vm1  ;;  %v857_v33 = vsel %vm793_vm2, 1.0, %v2943_v6 }
  0xad   : > { %vm792_vm7 = vmor %vm568_vm4, %vm728_vm0  ;;  %v859_v34 = vsel %vm795_vm5, 1.0, %v2943_v6  ;;  %vm732_vm5 = vcmp.eq.s32.totalorder %v3137_v59, %v644_v42 }
  0xae   : > { %vm794_vm8 = vmor %vm570_vm3, %vm730_vm6  ;;  %v917_v39 = vpack.c.bf16 %v859_v34, %v857_v33 }
  0xaf   : > { %2503 = vmatmul.msk.bf16.gmra.mxu0 %vm2502_vm11, %v2944_v12  ;;  %706 = vperm.xlu1 %2712, %v456_v21   ;;  %vm2504_vm9 = vmpackc.low %vm794_vm8, %vm792_vm7 }
  0xb0   : > { %549 = vperm.xlu2 %2713, %v425_v23   ;;  %703 = vperm.xlu0 %2711, %v455_v24  }
  0xb1   : > { %2533 = vmatmul.msk.bf16.gmra.mxu1 %vm1012_vm14, %v915_v26  ;;  %v487_v38 = vpop.permute.xlu1 %486  ;;  %v659_v57 = vpop.permute.xlu2 %658 }
  0xb2   : > { %v484_v32 = vpop.permute.xlu0 %483  ;;  %vm575_vm12 = vcmp.eq.s32.totalorder %v3140_v62, %v487_v38  ;;  %vm574_vm1 = vcmp.eq.s32.totalorder %v3137_v59, %v487_v38 }
  0xb3   : > { %vm573_vm11 = vcmp.eq.s32.totalorder %v3140_v62, %v484_v32  ;;  %vm572_vm2 = vcmp.eq.s32.totalorder %v3137_v59, %v484_v32 }
  0xb4   : > { %vm797_vm3 = vmor %vm573_vm11, %vm733_vm15 }
  0xb5   : > { %vm796_vm6 = vmor %vm572_vm2, %vm732_vm5  ;;  %v861_v45 = vsel %vm797_vm3, 1.0, %v2943_v6  ;;  %vm578_vm2 = vcmp.eq.s32.totalorder %v3137_v59, %v493_v47 }
  0xb7   : > { %709 = vperm.xlu1 %2712, %v457_v28  }
  0xb8   : > { %712 = vperm.xlu2 %2713, %v458_v29   ;;  %552 = vperm.xlu0 %2711, %v426_v30  }
  0xb9   : > { %v490_v43 = vpop.permute.xlu1 %489  ;;  %v662_v2 = vpop.permute.xlu2 %661 }
  0xba   : > { %v647_v40 = vpop.permute.xlu0 %646 }
  0xbb   : > { %vm735_vm10 = vcmp.eq.s32.totalorder %v3140_v62, %v647_v40  ;;  %vm734_vm13 = vcmp.eq.s32.totalorder %v3137_v59, %v647_v40 }
  0xbc   : > { %vm799_vm0 = vmor %vm575_vm12, %vm735_vm10  ;;  %vm579_vm10 = vcmp.eq.s32.totalorder %v3140_v62, %v493_v47  ;;  %vm577_vm12 = vcmp.eq.s32.totalorder %v3140_v62, %v490_v43 }
  0xbd   : > { %vm798_vm4 = vmor %vm574_vm1, %vm734_vm13  ;;  %v863_v44 = vsel %vm799_vm0, 1.0, %v2943_v6  ;;  %vm576_vm0 = vcmp.eq.s32.totalorder %v3137_v59, %v490_v43 }
  0xbe   : > { %vm2506_vm7 = vmpackc.low %vm798_vm4, %vm796_vm6  ;;  %v919_v46 = vpack.c.bf16 %v863_v44, %v861_v45 }
  0xbf   : > { %2505 = vmatmul.msk.bf16.gmra.mxu0 %vm2504_vm9, %v2944_v12  ;;  %558 = vperm.xlu1 %2712, %v428_v35  }
  0xc0   : > { %715 = vperm.xlu2 %2713, %v459_v36   ;;  %555 = vperm.xlu0 %2711, %v427_v37  }
  0xc1   : > { %2534 = vmatmul.msk.bf16.gmra.mxu1 %vm1012_vm14, %v917_v39  ;;  %v653_v48 = vpop.permute.xlu1 %652  ;;  %v511_v8 = vpop.permute.xlu2 %510 }
  0xc2   : > { %v650_v49 = vpop.permute.xlu0 %649  ;;  %vm739_vm8 = vcmp.eq.s32.totalorder %v3140_v62, %v653_v48  ;;  %vm738_vm13 = vcmp.eq.s32.totalorder %v3137_v59, %v653_v48 }
  0xc3   : > { %vm737_vm9 = vcmp.eq.s32.totalorder %v3140_v62, %v650_v49  ;;  %vm736_vm11 = vcmp.eq.s32.totalorder %v3137_v59, %v650_v49  ;;  %vm803_vm15 = vmor %vm579_vm10, %vm739_vm8  ;;  %vm581_vm8 = vcmp.eq.s32.totalorder %v3140_v62, %v496_v50  ;;  %vm743_vm10 = vcmp.eq.s32.totalorder %v3140_v62, %v659_v57 }
  0xc4   : > { %vm801_vm1 = vmor %vm577_vm12, %vm737_vm9  ;;  %v867_v51 = vsel %vm803_vm15, 1.0, %v2943_v6 }
  0xc5   : > { %vm800_vm3 = vmor %vm576_vm0, %vm736_vm11  ;;  %v865_v52 = vsel %vm801_vm1, 1.0, %v2943_v6  ;;  %vm742_vm0 = vcmp.eq.s32.totalorder %v3137_v59, %v659_v57 }
  0xc6   : > { %vm802_vm4 = vmor %vm578_vm2, %vm738_vm13  ;;  %v921_v54 = vpack.c.bf16 %v867_v51, %v865_v52  ;;  %vm580_vm13 = vcmp.eq.s32.totalorder %v3137_v59, %v496_v50 }
  0xc7   : > { %vm2508_vm5 = vmpackc.low %vm802_vm4, %vm800_vm3 }
  0xc8   : > { %718 = vperm.xlu0 %2711, %v460_v41  }
  0xc9   : > { %v656_v56 = vpop.permute.xlu1 %655  ;;  %v514_v14 = vpop.permute.xlu2 %513 }
  0xca   : > { %v499_v53 = vpop.permute.xlu0 %498  ;;  %vm741_vm6 = vcmp.eq.s32.totalorder %v3140_v62, %v656_v56  ;;  %vm740_vm9 = vcmp.eq.s32.totalorder %v3137_v59, %v656_v56 }
  0xcb   : > { %vm805_vm11 = vmor %vm581_vm8, %vm741_vm6  ;;  %vm582_vm12 = vcmp.eq.s32.totalorder %v3137_v59, %v499_v53  ;;  %vm745_vm8 = vcmp.eq.s32.totalorder %v3140_v62, %v662_v2 }
  0xcc   : > { %vm804_vm1 = vmor %vm580_vm13, %vm740_vm9  ;;  %v869_v60 = vsel %vm805_vm11, 1.0, %v2943_v6 }
  0xcd   : > { %vm806_vm2 = vmor %vm582_vm12, %vm742_vm0 }
  0xce   : > { %vm2510_vm3 = vmpackc.low %vm806_vm2, %vm804_vm1 }
  0xcf   : > { %2507 = vmatmul.msk.bf16.gmra.mxu0 %vm2506_vm7, %v2944_v12  ;;  %vm583_vm7 = vcmp.eq.s32.totalorder %v3140_v62, %v499_v53 }
  0xd0   : > { %vm807_vm15 = vmor %vm583_vm7, %vm743_vm10 }
  0xd1   : > { %2535 = vmatmul.msk.bf16.gmra.mxu1 %vm1012_vm14, %v919_v46  ;;  %v871_v61 = vsel %vm807_vm15, 1.0, %v2943_v6  ;;  %v505_v63 = vpop.permute.xlu1 %504  ;;  %vm744_vm15 = vcmp.eq.s32.totalorder %v3137_v59, %v662_v2  ;;  %v677_v20 = vpop.permute.xlu2 %676 }
  0xd2   : > { %v502_v58 = vpop.permute.xlu0 %501  ;;  %v923_v0 = vpack.c.bf16 %v871_v61, %v869_v60  ;;  %vm587_vm6 = vcmp.eq.s32.totalorder %v3140_v62, %v505_v63  ;;  %vm586_vm10 = vcmp.eq.s32.totalorder %v3137_v59, %v505_v63 }
  0xd3   : > { %vm584_vm11 = vcmp.eq.s32.totalorder %v3137_v59, %v502_v58 }
  0xd4   : > { %vm808_vm0 = vmor %vm584_vm11, %vm744_vm15  ;;  %vm590_vm11 = vcmp.eq.s32.totalorder %v3137_v59, %v511_v8 }
  0xd9   : > { %v508_v3 = vpop.permute.xlu1 %507  ;;  %v680_v30 = vpop.permute.xlu2 %679 }
  0xda   : > { %v665_v1 = vpop.permute.xlu0 %664 }
  0xdb   : > { %vm747_vm4 = vcmp.eq.s32.totalorder %v3140_v62, %v665_v1  ;;  %vm746_vm7 = vcmp.eq.s32.totalorder %v3137_v59, %v665_v1 }
  0xdc   : > { %vm811_vm9 = vmor %vm587_vm6, %vm747_vm4  ;;  %vm591_vm4 = vcmp.eq.s32.totalorder %v3140_v62, %v511_v8  ;;  %vm589_vm6 = vcmp.eq.s32.totalorder %v3140_v62, %v508_v3 }
  0xdd   : > { %vm810_vm13 = vmor %vm586_vm10, %vm746_vm7  ;;  %v875_v4 = vsel %vm811_vm9, 1.0, %v2943_v6  ;;  %vm588_vm9 = vcmp.eq.s32.totalorder %v3137_v59, %v508_v3 }
  0xde   : > { %vm2512_vm1 = vmpackc.low %vm810_vm13, %vm808_vm0 }
  0xdf   : > { %2509 = vmatmul.msk.bf16.gmra.mxu0 %vm2508_vm5, %v2944_v12  ;;  %vm585_vm5 = vcmp.eq.s32.totalorder %v3140_v62, %v502_v58 }
  0xe0   : > { %vm809_vm12 = vmor %vm585_vm5, %vm745_vm8 }
  0xe1   : > { %2536 = vmatmul.msk.bf16.gmra.mxu1 %vm1012_vm14, %v921_v54  ;;  %v873_v5 = vsel %vm809_vm12, 1.0, %v2943_v6  ;;  %v671_v9 = vpop.permute.xlu1 %670  ;;  %v529_v41 = vpop.permute.xlu2 %528 }
  0xe2   : > { %v925_v7 = vpack.c.bf16 %v875_v4, %v873_v5  ;;  %v668_v10 = vpop.permute.xlu0 %667  ;;  %vm751_vm2 = vcmp.eq.s32.totalorder %v3140_v62, %v671_v9  ;;  %vm750_vm7 = vcmp.eq.s32.totalorder %v3137_v59, %v671_v9 }
  0xe3   : > { %vm748_vm5 = vcmp.eq.s32.totalorder %v3137_v59, %v668_v10  ;;  %vm815_vm8 = vmor %vm591_vm4, %vm751_vm2  ;;  %vm593_vm2 = vcmp.eq.s32.totalorder %v3140_v62, %v514_v14  ;;  %vm755_vm4 = vcmp.eq.s32.totalorder %v3140_v62, %v677_v20 }
  0xe4   : > { %vm812_vm12 = vmor %vm588_vm9, %vm748_vm5  ;;  %v879_v15 = vsel %vm815_vm8, 1.0, %v2943_v6  ;;  %vm754_vm9 = vcmp.eq.s32.totalorder %v3137_v59, %v677_v20 }
  0xe5   : > { %vm814_vm13 = vmor %vm590_vm11, %vm750_vm7  ;;  %vm592_vm7 = vcmp.eq.s32.totalorder %v3137_v59, %v514_v14 }
  0xe6   : > { %vm2514_vm15 = vmpackc.low %vm814_vm13, %vm812_vm12 }
  0xe9   : > { %v674_v19 = vpop.permute.xlu1 %673  ;;  %v532_v49 = vpop.permute.xlu2 %531 }
  0xea   : > { %v517_v17 = vpop.permute.xlu0 %516  ;;  %vm753_vm0 = vcmp.eq.s32.totalorder %v3140_v62, %v674_v19 }
  0xeb   : > { %vm817_vm5 = vmor %vm593_vm2, %vm753_vm0  ;;  %vm1279_vm2 = vcmask 261120  }
  0xec   : > { %v881_v22 = vsel %vm817_vm5, 1.0, %v2943_v6 }
  0xef   : > { %2511 = vmatmul.msk.bf16.gmra.mxu0 %vm2510_vm3, %v2944_v12  ;;  %vm749_vm3 = vcmp.eq.s32.totalorder %v3140_v62, %v668_v10 }
  0xf0   : > { %vm813_vm10 = vmor %vm589_vm6, %vm749_vm3  ;;  %vm752_vm3 = vcmp.eq.s32.totalorder %v3137_v59, %v674_v19  ;;  %vm594_vm6 = vcmp.eq.s32.totalorder %v3137_v59, %v517_v17 }
  0xf1   : > { %2537 = vmatmul.msk.bf16.gmra.mxu1 %vm1012_vm14, %v923_v0  ;;  %v877_v16 = vsel %vm813_vm10, 1.0, %v2943_v6  ;;  %vm816_vm10 = vmor %vm592_vm7, %vm752_vm3  ;;  %v523_v25 = vpop.permute.xlu1 %522  ;;  %vm757_vm3 = vcmp.eq.s32.totalorder %v3140_v62, %v680_v30  ;;  %v695_v60 = vpop.permute.xlu2 %694 }
  0xf2   : > { %v927_v18 = vpack.c.bf16 %v879_v15, %v877_v16  ;;  %v520_v21 = vpop.permute.xlu0 %519  ;;  %vm818_vm11 = vmor %vm594_vm6, %vm754_vm9  ;;  %vm599_vm0 = vcmp.eq.s32.totalorder %v3140_v62, %v523_v25  ;;  %vm598_vm5 = vcmp.eq.s32.totalorder %v3137_v59, %v523_v25  ;;  %vm756_vm9 = vcmp.eq.s32.totalorder %v3137_v59, %v680_v30 }
  0xf3   : > { %vm2516_vm12 = vmpackc.low %vm818_vm11, %vm816_vm10  ;;  %vm596_vm6 = vcmp.eq.s32.totalorder %v3137_v59, %v520_v21 }
  0xf4   : > { %vm820_vm10 = vmor %vm596_vm6, %vm756_vm9 }
  0xf9   : > { %v526_v34 = vpop.permute.xlu1 %525 }
  0xfa   : > { %v683_v28 = vpop.permute.xlu0 %682  ;;  %v698_v13 = vpop.permute.xlu2 %697 }
  0xfb   : > { %vm759_vm13 = vcmp.eq.s32.totalorder %v3140_v62, %v683_v28 }
  0xff   : > { %2513 = vmatmul.msk.bf16.gmra.mxu0 %vm2512_vm1, %v2944_v12  ;;  %vm595_vm1 = vcmp.eq.s32.totalorder %v3140_v62, %v517_v17 }
 0x100   : > { %vm819_vm8 = vmor %vm595_vm1, %vm755_vm4  ;;  %vm758_vm1 = vcmp.eq.s32.totalorder %v3137_v59, %v683_v28 }
 0x101   : > { %2538 = vmatmul.msk.bf16.gmra.mxu1 %vm1012_vm14, %v925_v7  ;;  %v883_v23 = vsel %vm819_vm8, 1.0, %v2943_v6  ;;  %vm823_vm4 = vmor %vm599_vm0, %vm759_vm13  ;;  %v689_v42 = vpop.permute.xlu1 %688 }
 0x102   : > { %v929_v27 = vpack.c.bf16 %v883_v23, %v881_v22  ;;  %vm822_vm8 = vmor %vm598_vm5, %vm758_vm1  ;;  %v887_v36 = vsel %vm823_vm4, 1.0, %v2943_v6  ;;  %v686_v43 = vpop.permute.xlu0 %685  ;;  %vm601_vm1 = vcmp.eq.s32.totalorder %v3140_v62, %v526_v34  ;;  %vm600_vm5 = vcmp.eq.s32.totalorder %v3137_v59, %v526_v34 }
 0x103   : > { %vm2518_vm11 = vmpackc.low %vm822_vm8, %vm820_vm10  ;;  %vm761_vm13 = vcmp.eq.s32.totalorder %v3140_v62, %v686_v43  ;;  %vm760_vm0 = vcmp.eq.s32.totalorder %v3137_v59, %v686_v43 }
 0x104   : > { %vm825_vm6 = vmor %vm601_vm1, %vm761_vm13  ;;  %vm605_vm13 = vcmp.eq.s32.totalorder %v3140_v62, %v532_v49 }
 0x105   : > { %vm824_vm8 = vmor %vm600_vm5, %vm760_vm0  ;;  %v889_v51 = vsel %vm825_vm6, 1.0, %v2943_v6  ;;  %vm767_vm0 = vcmp.eq.s32.totalorder %v3140_v62, %v695_v60  ;;  %vm766_vm6 = vcmp.eq.s32.totalorder %v3137_v59, %v695_v60 }
 0x109   : > { %v692_v57 = vpop.permute.xlu1 %691 }
 0x10a   : > { %v535_v54 = vpop.permute.xlu0 %534 }
 0x10f   : > { %2515 = vmatmul.msk.bf16.gmra.mxu0 %vm2514_vm15, %v2944_v12  ;;  %vm597_vm15 = vcmp.eq.s32.totalorder %v3140_v62, %v520_v21 }
 0x110   : > { %vm821_vm7 = vmor %vm597_vm15, %vm757_vm3  ;;  %vm603_vm15 = vcmp.eq.s32.totalorder %v3140_v62, %v529_v41  ;;  %vm762_vm3 = vcmp.eq.s32.totalorder %v3137_v59, %v689_v42 }
 0x111   : > { %2539 = vmatmul.msk.bf16.gmra.mxu1 %vm1012_vm14, %v927_v18  ;;  %v885_v38 = vsel %vm821_vm7, 1.0, %v2943_v6  ;;  %vm602_vm7 = vcmp.eq.s32.totalorder %v3137_v59, %v529_v41  ;;  %v541_v7 = vpop.permute.xlu1 %540 }
 0x112   : > { %v931_v40 = vpack.c.bf16 %v887_v36, %v885_v38  ;;  %vm826_vm9 = vmor %vm602_vm7, %vm762_vm3  ;;  %vm606_vm3 = vcmp.eq.s32.totalorder %v3137_v59, %v535_v54  ;;  %v538_v1 = vpop.permute.xlu0 %537 }
 0x113   : > { %vm2520_vm10 = vmpackc.low %vm826_vm9, %vm824_vm8 }
 0x114   : > { %vm830_vm8 = vmor %vm606_vm3, %vm766_vm6  ;;  %vm608_vm3 = vcmp.eq.s32.totalorder %v3137_v59, %v538_v1  ;;  %vm768_vm6 = vcmp.eq.s32.totalorder %v3137_v59, %v698_v13 }
 0x119   : > { %v544_v17 = vpop.permute.xlu1 %543 }
 0x11a   : > { %v701_v10 = vpop.permute.xlu0 %700 }
 0x11c   : > { %v1074_v24 = vpop.f32.mrf.mxu0 }
 0x11e   : > { %v1163_v26 = vpop.f32.mrf.mxu1 }
 0x11f   : > { %2517 = vmatmul.msk.bf16.gmra.mxu0 %vm2516_vm12, %v2944_v12  ;;  %v1164_v32 = vadd.f32 %v1163_v26, %v1074_v24  ;;  %vm763_vm12 = vcmp.eq.s32.totalorder %v3140_v62, %v689_v42  ;;  %v547_v24 = vpop.permute.xlu2 %546 }
 0x120   : > { %vm827_vm4 = vmor %vm603_vm15, %vm763_vm12  ;;  %vm607_vm12 = vcmp.eq.s32.totalorder %v3140_v62, %v535_v54  ;;  %vm764_vm15 = vcmp.eq.s32.totalorder %v3137_v59, %v692_v57 }
 0x121   : > { %2540 = vmatmul.msk.bf16.gmra.mxu1 %vm1012_vm14, %v929_v27  ;;  %v891_v50 = vsel %vm827_vm4, 1.0, %v2943_v6  ;;  %vm604_vm4 = vcmp.eq.s32.totalorder %v3137_v59, %v532_v49  ;;  %vm831_vm5 = vmor %vm607_vm12, %vm767_vm0  ;;  %vm611_vm12 = vcmp.eq.s32.totalorder %v3140_v62, %v541_v7  ;;  %v707_v25 = vpop.permute.xlu1 %706 }
 0x122   : > { %v933_v56 = vpack.c.bf16 %v891_v50, %v889_v51  ;;  %vm828_vm7 = vmor %vm604_vm4, %vm764_vm15  ;;  %v895_v4 = vsel %vm831_vm5, 1.0, %v2943_v6  ;;  %vm769_vm15 = vcmp.eq.s32.totalorder %v3140_v62, %v698_v13  ;;  %v704_v26 = vpop.permute.xlu0 %703  ;;  %v2660_v50 = vld [vmem:[%s3675_s5 + $0x38] sm:$0xff] }
 0x123   : > { %vm2522_vm9 = vmpackc.low %vm830_vm8, %vm828_vm7  ;;  %1533 = vmatpush.bf16.msra.mxu3 %v2660_v50 }
 0x124   : > { %v1076_v29 = vpop.f32.mrf.mxu0  ;;  %vm832_vm7 = vmor %vm608_vm3, %vm768_vm6 }
 0x126   : > { %v1165_v31 = vpop.f32.mrf.mxu1 }
 0x127   : > { %v1166_v33 = vadd.f32 %v1165_v31, %v1076_v29 }
 0x129   : > { %v1243_v35 = vpack.c.bf16 %v1166_v33, %v1164_v32  ;;  %v550_v32 = vpop.permute.xlu2 %549 }
 0x12a   : > { %v553_v38 = vpop.permute.xlu0 %552 }
 0x12b   : > { %2556 = vmatmul.msk.bf16.vlgmr.msra.gmra.mxu2 %vm1279_vm2, %v1243_v35 }
 0x12c   : > { %v1079_v37 = vpop.f32.mrf.mxu0 }
 0x12e   : > { %v1168_v39 = vpop.f32.mrf.mxu1 }
 0x12f   : > { %2519 = vmatmul.msk.bf16.gmra.mxu0 %vm2518_vm11, %v2944_v12  ;;  %v1169_v46 = vadd.f32 %v1168_v39, %v1079_v37  ;;  %vm765_vm11 = vcmp.eq.s32.totalorder %v3140_v62, %v692_v57  ;;  %v710_v39 = vpop.permute.xlu1 %709 }
 0x130   : > { %vm829_vm1 = vmor %vm605_vm13, %vm765_vm11  ;;  %vm609_vm11 = vcmp.eq.s32.totalorder %v3140_v62, %v538_v1  ;;  %vm770_vm13 = vcmp.eq.s32.totalorder %v3137_v59, %v701_v10 }
 0x131   : > { %2541 = vmatmul.msk.bf16.gmra.mxu1 %vm1012_vm14, %v931_v40  ;;  %v893_v3 = vsel %vm829_vm1, 1.0, %v2943_v6  ;;  %vm610_vm1 = vcmp.eq.s32.totalorder %v3137_v59, %v541_v7  ;;  %vm833_vm4 = vmor %vm609_vm11, %vm769_vm15  ;;  %vm615_vm11 = vcmp.eq.s32.totalorder %v3140_v62, %v547_v24  ;;  %v713_v41 = vpop.permute.xlu2 %712 }
 0x132   : > { %v935_v9 = vpack.c.bf16 %v895_v4, %v893_v3  ;;  %vm834_vm5 = vmor %vm610_vm1, %vm770_vm13  ;;  %v897_v21 = vsel %vm833_vm4, 1.0, %v2943_v6  ;;  %vm613_vm13 = vcmp.eq.s32.totalorder %v3140_v62, %v544_v17  ;;  %vm614_vm1 = vcmp.eq.s32.totalorder %v3137_v59, %v547_v24  ;;  %v2656_v4 = vld [vmem:[%s3675_s5 + $0x18] sm:$0xff] }
 0x133   : > { %vm2524_vm8 = vmpackc.low %vm834_vm5, %vm832_vm7  ;;  %vm612_vm4 = vcmp.eq.s32.totalorder %v3137_v59, %v544_v17 }
 0x134   : > { %v1081_v44 = vpop.f32.mrf.mxu0 }
 0x136   : > { %v1170_v45 = vpop.f32.mrf.mxu1 }
 0x137   : > { %v1171_v47 = vadd.f32 %v1170_v45, %v1081_v44  ;;  %v556_v45 = vpop.permute.xlu0 %555  ;;  %v559_v57 = vpop.permute.xlu1 %558 }
 0x139   : > { %v1244_v48 = vpack.c.bf16 %v1171_v47, %v1169_v46  ;;  %v716_v60 = vpop.permute.xlu2 %715 }
 0x13b   : > { %2557 = vmatmul.msk.bf16.gmra.mxu2 %vm1279_vm2, %v1244_v48 }
 0x13c   : > { %v1084_v52 = vpop.f32.mrf.mxu0 }
 0x13e   : > { %v1173_v53 = vpop.f32.mrf.mxu1 }
 0x13f   : > { %2521 = vmatmul.msk.bf16.gmra.mxu0 %vm2520_vm10, %v2944_v12  ;;  %v1174_v63 = vadd.f32 %v1173_v53, %v1084_v52  ;;  %vm771_vm10 = vcmp.eq.s32.totalorder %v3140_v62, %v701_v10  ;;  %v2659_v53 = vld [vmem:[%s3675_s5 + $0x30] sm:$0xff]  ;;  %v719_v54 = vpop.permute.xlu0 %718  ;;  %v2654_v10 = vld [vmem:[%s3675_s5 + $0x8] sm:$0xff] }
 0x140   : > { %vm835_vm0 = vmor %vm611_vm12, %vm771_vm10  ;;  %vm773_vm10 = vcmp.eq.s32.totalorder %v3140_v62, %v704_v26  ;;  %vm774_vm12 = vcmp.eq.s32.totalorder %v3137_v59, %v707_v25  ;;  %1534 = vmatpush.bf16.msra.mxu3 %v2659_v53 }
 0x141   : > { %2542 = vmatmul.msk.bf16.gmra.mxu1 %vm1012_vm14, %v933_v56  ;;  %v899_v19 = vsel %vm835_vm0, 1.0, %v2943_v6  ;;  %vm772_vm0 = vcmp.eq.s32.totalorder %v3137_v59, %v704_v26  ;;  %vm837_vm3 = vmor %vm613_vm13, %vm773_vm10  ;;  %vm617_vm10 = vcmp.eq.s32.totalorder %v3140_v62, %v550_v32 }
 0x142   : > { %v937_v23 = vpack.c.bf16 %v899_v19, %v897_v21  ;;  %vm838_vm5 = vmor %vm614_vm1, %vm774_vm12  ;;  %v901_v34 = vsel %vm837_vm3, 1.0, %v2943_v6  ;;  %vm779_vm12 = vcmp.eq.s32.totalorder %v3140_v62, %v713_v41  ;;  %vm778_vm3 = vcmp.eq.s32.totalorder %v3137_v59, %v713_v41 }
 0x143   : > { %vm836_vm6 = vmor %vm612_vm4, %vm772_vm0  ;;  %vm616_vm0 = vcmp.eq.s32.totalorder %v3137_v59, %v550_v32 }
 0x144   : > { %v1086_v58 = vpop.f32.mrf.mxu0  ;;  %vm2526_vm7 = vmpackc.low %vm838_vm5, %vm836_vm6 }
 0x146   : > { %v1175_v61 = vpop.f32.mrf.mxu1 }
 0x147   : > { %v1176_v0 = vadd.f32 %v1175_v61, %v1086_v58  ;;  %v2658_v58 = vld [vmem:[%s3675_s5 + $0x28] sm:$0xff] }
 0x148   : > { %1535 = vmatpush.bf16.msra.mxu3 %v2658_v58 }
 0x149   : > { %v1245_v2 = vpack.c.bf16 %v1176_v0, %v1174_v63 }
 0x14b   : > { %2558 = vmatmul.msk.bf16.gmra.mxu2 %vm1279_vm2, %v1245_v2  ;;  %v2657_v2 = vld [vmem:[%s3675_s5 + $0x20] sm:$0xff] }
 0x14c   : > { %v1089_v5 = vpop.f32.mrf.mxu0  ;;  %1536 = vmatpush.bf16.msra.mxu3 %v2657_v2 }
 0x14e   : > { %v1178_v8 = vpop.f32.mrf.mxu1 }
 0x14f   : > { %2523 = vmatmul.msk.bf16.gmra.mxu0 %vm2522_vm9, %v2944_v12  ;;  %v1179_v15 = vadd.f32 %v1178_v8, %v1089_v5  ;;  %vm775_vm9 = vcmp.eq.s32.totalorder %v3140_v62, %v707_v25  ;;  %v3395_v25 = vld [vmem:[%s3674_s4] ss:$0 sm:$0xff] }
 0x150   : > { %vm839_vm15 = vmor %vm615_vm11, %vm775_vm9  ;;  %vm619_vm9 = vcmp.eq.s32.totalorder %v3140_v62, %v553_v38  ;;  %vm776_vm11 = vcmp.eq.s32.totalorder %v3137_v59, %v710_v39  ;;  %1537 = vmatpush.bf16.msra.mxu3 %v2656_v4 }
 0x151   : > { %2543 = vmatmul.msk.bf16.gmra.mxu1 %vm1012_vm14, %v935_v9  ;;  %v903_v33 = vsel %vm839_vm15, 1.0, %v2943_v6  ;;  %vm618_vm15 = vcmp.eq.s32.totalorder %v3137_v59, %v553_v38  ;;  %vm843_vm1 = vmor %vm619_vm9, %vm779_vm12  ;;  %vm623_vm9 = vcmp.eq.s32.totalorder %v3140_v62, %v559_v57 }
 0x152   : > { %v939_v37 = vpack.c.bf16 %v903_v33, %v901_v34  ;;  %vm840_vm4 = vmor %vm616_vm0, %vm776_vm11  ;;  %v907_v48 = vsel %vm843_vm1, 1.0, %v2943_v6  ;;  %vm781_vm11 = vcmp.eq.s32.totalorder %v3140_v62, %v716_v60 }
 0x153   : > { %vm842_vm5 = vmor %vm618_vm15, %vm778_vm3  ;;  %vm620_vm15 = vcmp.eq.s32.totalorder %v3137_v59, %v556_v45  ;;  %vm780_vm3 = vcmp.eq.s32.totalorder %v3137_v59, %v716_v60 }
 0x154   : > { %v1091_v11 = vpop.f32.mrf.mxu0  ;;  %vm2528_vm6 = vmpackc.low %vm842_vm5, %vm840_vm4 }
 0x155   : > { %vm844_vm4 = vmor %vm620_vm15, %vm780_vm3 }
 0x156   : > { %v1180_v14 = vpop.f32.mrf.mxu1 }
 0x157   : > { %v1181_v16 = vadd.f32 %v1180_v14, %v1091_v11 }
 0x159   : > { %v1246_v18 = vpack.c.bf16 %v1181_v16, %v1179_v15 }
 0x15b   : > { %2559 = vmatmul.msk.bf16.gmra.mxu2 %vm1279_vm2, %v1246_v18 }
 0x15c   : > { %v1094_v20 = vpop.f32.mrf.mxu0 }
 0x15e   : > { %v1183_v22 = vpop.f32.mrf.mxu1 }
 0x15f   : > { %2525 = vmatmul.msk.bf16.gmra.mxu0 %vm2524_vm8, %v2944_v12  ;;  %v1184_v29 = vadd.f32 %v1183_v22, %v1094_v20  ;;  %vm777_vm8 = vcmp.eq.s32.totalorder %v3140_v62, %v710_v39 }
 0x160   : > { %vm841_vm13 = vmor %vm617_vm10, %vm777_vm8  ;;  %vm621_vm8 = vcmp.eq.s32.totalorder %v3140_v62, %v556_v45  ;;  %vm782_vm10 = vcmp.eq.s32.totalorder %v3137_v59, %v719_v54 }
 0x161   : > { %2544 = vmatmul.msk.bf16.gmra.mxu1 %vm1012_vm14, %v937_v23  ;;  %v905_v47 = vsel %vm841_vm13, 1.0, %v2943_v6  ;;  %vm622_vm13 = vcmp.eq.s32.totalorder %v3137_v59, %v559_v57  ;;  %vm845_vm0 = vmor %vm621_vm8, %vm781_vm11  ;;  %v2655_v59 = vld [vmem:[%s3675_s5 + $0x10] sm:$0xff] }
 0x162   : > { %v941_v52 = vpack.c.bf16 %v907_v48, %v905_v47  ;;  %vm846_vm1 = vmor %vm622_vm13, %vm782_vm10  ;;  %v909_v5 = vsel %vm845_vm0, 1.0, %v2943_v6  ;;  %1538 = vmatpush.bf16.msra.mxu3 %v2655_v59 }
 0x163   : > { %vm2530_vm5 = vmpackc.low %vm846_vm1, %vm844_vm4 }
 0x164   : > { %v1096_v27 = vpop.f32.mrf.mxu0 }
 0x166   : > { %v1185_v28 = vpop.f32.mrf.mxu1  ;;  %1539 = vmatpush.bf16.msra.mxu3 %v2654_v10 }
 0x167   : > { %v1186_v30 = vadd.f32 %v1185_v28, %v1096_v27 }
 0x169   : > { %v1247_v31 = vpack.c.bf16 %v1186_v30, %v1184_v29 }
 0x16b   : > { %2560 = vmatmul.msk.bf16.gmra.mxu2 %vm1279_vm2, %v1247_v31 }
 0x16c   : > { %v1099_v35 = vpop.f32.mrf.mxu0 }
 0x16e   : > { %v1188_v36 = vpop.f32.mrf.mxu1 }
 0x16f   : > { %2527 = vmatmul.msk.bf16.gmra.mxu0 %vm2526_vm7, %v2944_v12  ;;  %v1189_v43 = vadd.f32 %v1188_v36, %v1099_v35  ;;  %vm783_vm7 = vcmp.eq.s32.totalorder %v3140_v62, %v719_v54 }
 0x170   : > { %vm847_vm12 = vmor %vm623_vm9, %vm783_vm7 }
 0x171   : > { %2545 = vmatmul.msk.bf16.gmra.mxu1 %vm1012_vm14, %v939_v37  ;;  %v911_v3 = vsel %vm847_vm12, 1.0, %v2943_v6 }
 0x172   : > { %v943_v8 = vpack.c.bf16 %v911_v3, %v909_v5 }
 0x174   : > { %v1101_v40 = vpop.f32.mrf.mxu0 }
 0x176   : > { %v1190_v42 = vpop.f32.mrf.mxu1 }
 0x177   : > { %v1191_v44 = vadd.f32 %v1190_v42, %v1101_v40 }
 0x179   : > { %v1248_v46 = vpack.c.bf16 %v1191_v44, %v1189_v43 }
 0x17b   : > { %2561 = vmatmul.msk.bf16.gmra.mxu2 %vm1279_vm2, %v1248_v46 }
 0x17c   : > { %v1104_v49 = vpop.f32.mrf.mxu0 }
 0x17e   : > { %v1193_v51 = vpop.f32.mrf.mxu1 }
 0x17f   : > { %2529 = vmatmul.msk.bf16.gmra.mxu0 %vm2528_vm6, %v2944_v12  ;;  %v1194_v63 = vadd.f32 %v1193_v51, %v1104_v49 }
 0x181   : > { %2546 = vmatmul.msk.bf16.gmra.mxu1 %vm1012_vm14, %v941_v52 }
 0x184   : > { %v1106_v56 = vpop.f32.mrf.mxu0 }
 0x186   : > { %v1195_v61 = vpop.f32.mrf.mxu1 }
 0x187   : > { %v1196_v0 = vadd.f32 %v1195_v61, %v1106_v56 }
 0x189   : > { %v1249_v1 = vpack.c.bf16 %v1196_v0, %v1194_v63 }
 0x18b   : > { %2562 = vmatmul.msk.bf16.gmra.mxu2 %vm1279_vm2, %v1249_v1 }
 0x18c   : > { %v1109_v62 = vpop.f32.mrf.mxu0 }
 0x18e   : > { %v1198_v7 = vpop.f32.mrf.mxu1 }
 0x18f   : > { %2531 = vmatmul.msk.bf16.gmra.mxu0 %vm2530_vm5, %v2944_v12  ;;  %v1199_v6 = vadd.f32 %v1198_v7, %v1109_v62  ;;  %v2653_v12 = vld [vmem:[%s3675_s5] sm:$0xff] }
 0x190   : > { %1540 = vmatpush.bf16.msra.mxu3 %v2653_v12 }
 0x191   : > { %2547 = vmatmul.msk.bf16.gmra.mxu1 %vm1012_vm14, %v943_v8 }
 0x194   : > { %v1111_v9 = vpop.f32.mrf.mxu0 }
 0x196   : > { %v1200_v11 = vpop.f32.mrf.mxu1 }
 0x197   : > { %v1201_v13 = vadd.f32 %v1200_v11, %v1111_v9 }
 0x199   : > { %v1250_v14 = vpack.c.bf16 %v1201_v13, %v1199_v6 }
 0x19b   : > { %2563 = vmatmul.msk.bf16.gmra.mxu2 %vm1279_vm2, %v1250_v14 }
 0x19c   : > { %v1114_v15 = vpop.f32.mrf.mxu0 }
 0x19e   : > { %v1203_v16 = vpop.f32.mrf.mxu1 }
 0x19f   : > { %v1204_v19 = vadd.f32 %v1203_v16, %v1114_v15 }
 0x1a4   : > { %v1116_v17 = vpop.f32.mrf.mxu0 }
 0x1a6   : > { %v1205_v18 = vpop.f32.mrf.mxu1 }
 0x1a7   : > { %v1206_v20 = vadd.f32 %v1205_v18, %v1116_v17 }
 0x1a9   : > { %v1251_v21 = vpack.c.bf16 %v1206_v20, %v1204_v19 }
 0x1ab   : > { %2564 = vmatmul.msk.bf16.gmra.mxu2 %vm1279_vm2, %v1251_v21 }
 0x1ac   : > { %v1119_v22 = vpop.f32.mrf.mxu0 }
 0x1ae   : > { %v1208_v23 = vpop.f32.mrf.mxu1  ;;  %v1337_v24 = vpop.f32.mrf.mxu2 }
 0x1af   : > { %v1338_v27 = vadd.f32 %v3395_v25, %v1337_v24  ;;  %v1209_v30 = vadd.f32 %v1208_v23, %v1119_v22 }
 0x1b1   : > { %v1417_v33 = vmax.f32 %v1338_v27, 0.0 }
 0x1b4   : > { %v1121_v26 = vpop.f32.mrf.mxu0 }
 0x1b6   : > { %v1210_v28 = vpop.f32.mrf.mxu1  ;;  %v1339_v29 = vpop.f32.mrf.mxu2 }
 0x1b7   : > { %v1211_v31 = vadd.f32 %v1210_v28, %v1121_v26  ;;  %v1340_v32 = vadd.f32 %v3395_v25, %v1339_v29 }
 0x1b9   : > { %v1252_v34 = vpack.c.bf16 %v1211_v31, %v1209_v30  ;;  %v1418_v35 = vmax.f32 %v1340_v32, 0.0 }
 0x1bb   : > { %2565 = vmatmul.msk.bf16.gmra.mxu2 %vm1279_vm2, %v1252_v34  ;;  %v1449_v36 = vpack.c.bf16 %v1418_v35, %v1417_v33 }
 0x1bc   : > { %v1124_v37 = vpop.f32.mrf.mxu0 }
 0x1bd   : > { %1541 = vmatmul.bf16.vlgmr.msra.gmra.mxu3 %v1449_v36 }
 0x1be   : > { %v1213_v38 = vpop.f32.mrf.mxu1  ;;  %v1342_v39 = vpop.f32.mrf.mxu2 }
 0x1bf   : > { %v1343_v41 = vadd.f32 %v3395_v25, %v1342_v39  ;;  %v1214_v44 = vadd.f32 %v1213_v38, %v1124_v37 }
 0x1c1   : > { %v1419_v47 = vmax.f32 %v1343_v41, 0.0 }
 0x1c4   : > { %v1126_v40 = vpop.f32.mrf.mxu0 }
 0x1c6   : > { %v1215_v42 = vpop.f32.mrf.mxu1  ;;  %v1344_v43 = vpop.f32.mrf.mxu2 }
 0x1c7   : > { %v1216_v45 = vadd.f32 %v1215_v42, %v1126_v40  ;;  %v1345_v46 = vadd.f32 %v3395_v25, %v1344_v43 }
 0x1c9   : > { %v1253_v48 = vpack.c.bf16 %v1216_v45, %v1214_v44  ;;  %v1420_v49 = vmax.f32 %v1345_v46, 0.0 }
 0x1cb   : > { %2566 = vmatmul.msk.bf16.gmra.mxu2 %vm1279_vm2, %v1253_v48  ;;  %v1450_v50 = vpack.c.bf16 %v1420_v49, %v1419_v47 }
 0x1cc   : > { %v1129_v51 = vpop.f32.mrf.mxu0 }
 0x1cd   : > { %1546 = vmatmul.bf16.gmra.mxu3 %v1450_v50 }
 0x1ce   : > { %v1218_v52 = vpop.f32.mrf.mxu1  ;;  %v1347_v53 = vpop.f32.mrf.mxu2 }
 0x1cf   : > { %v1348_v56 = vadd.f32 %v3395_v25, %v1347_v53  ;;  %v1219_v60 = vadd.f32 %v1218_v52, %v1129_v51 }
 0x1d1   : > { %v1421_v0 = vmax.f32 %v1348_v56, 0.0 }
 0x1d4   : > { %v1131_v54 = vpop.f32.mrf.mxu0 }
 0x1d6   : > { %v1220_v57 = vpop.f32.mrf.mxu1  ;;  %v1349_v58 = vpop.f32.mrf.mxu2 }
 0x1d7   : > { %v1221_v61 = vadd.f32 %v1220_v57, %v1131_v54  ;;  %v1350_v63 = vadd.f32 %v3395_v25, %v1349_v58 }
 0x1d9   : > { %v1254_v1 = vpack.c.bf16 %v1221_v61, %v1219_v60  ;;  %v1422_v2 = vmax.f32 %v1350_v63, 0.0 }
 0x1db   : > { %2567 = vmatmul.msk.bf16.gmra.mxu2 %vm1279_vm2, %v1254_v1  ;;  %v1451_v3 = vpack.c.bf16 %v1422_v2, %v1421_v0 }
 0x1dc   : > { %v1134_v62 = vpop.f32.mrf.mxu0 }
 0x1dd   : > { %1551 = vmatmul.bf16.gmra.mxu3 %v1451_v3 }
 0x1de   : > { %v1223_v4 = vpop.f32.mrf.mxu1  ;;  %v1352_v5 = vpop.f32.mrf.mxu2 }
 0x1df   : > { %v1353_v8 = vadd.f32 %v3395_v25, %v1352_v5  ;;  %v1224_v10 = vadd.f32 %v1223_v4, %v1134_v62 }
 0x1e1   : > { %v1423_v13 = vmax.f32 %v1353_v8, 0.0 }
 0x1e4   : > { %v1136_v7 = vpop.f32.mrf.mxu0 }
 0x1e6   : > { %v1225_v59 = vpop.f32.mrf.mxu1  ;;  %v1354_v9 = vpop.f32.mrf.mxu2 }
 0x1e7   : > { %v1226_v11 = vadd.f32 %v1225_v59, %v1136_v7  ;;  %v1355_v6 = vadd.f32 %v3395_v25, %v1354_v9 }
 0x1e9   : > { %v1255_v14 = vpack.c.bf16 %v1226_v11, %v1224_v10  ;;  %v1424_v12 = vmax.f32 %v1355_v6, 0.0  ;;  %v3425_v11 = vld [vmem:[%s3676_s6] ss:$0 sm:$0xff] }
 0x1eb   : > { %2568 = vmatmul.msk.bf16.gmra.mxu2 %vm1279_vm2, %v1255_v14  ;;  %v1452_v15 = vpack.c.bf16 %v1424_v12, %v1423_v13 }
 0x1ec   : > { %v1139_v16 = vpop.f32.mrf.mxu0 }
 0x1ed   : > { %1556 = vmatmul.bf16.gmra.mxu3 %v1452_v15 }
 0x1ee   : > { %v1228_v17 = vpop.f32.mrf.mxu1  ;;  %v1357_v18 = vpop.f32.mrf.mxu2 }
 0x1ef   : > { %v1358_v20 = vadd.f32 %v3395_v25, %v1357_v18  ;;  %v1229_v23 = vadd.f32 %v1228_v17, %v1139_v16 }
 0x1f1   : > { %v1425_v27 = vmax.f32 %v1358_v20, 0.0 }
 0x1f4   : > { %v1141_v19 = vpop.f32.mrf.mxu0 }
 0x1f6   : > { %v1230_v21 = vpop.f32.mrf.mxu1  ;;  %v1359_v22 = vpop.f32.mrf.mxu2 }
 0x1f7   : > { %v1231_v24 = vadd.f32 %v1230_v21, %v1141_v19  ;;  %v1360_v26 = vadd.f32 %v3395_v25, %v1359_v22 }
 0x1f9   : > { %v1256_v28 = vpack.c.bf16 %v1231_v24, %v1229_v23  ;;  %v1426_v29 = vmax.f32 %v1360_v26, 0.0 }
 0x1fb   : > { %2569 = vmatmul.msk.bf16.gmra.mxu2 %vm1279_vm2, %v1256_v28  ;;  %v1453_v30 = vpack.c.bf16 %v1426_v29, %v1425_v27 }
 0x1fc   : > { %v1144_v31 = vpop.f32.mrf.mxu0 }
 0x1fd   : > { %1561 = vmatmul.bf16.gmra.mxu3 %v1453_v30 }
 0x1fe   : > { %v1233_v32 = vpop.f32.mrf.mxu1  ;;  %v1362_v33 = vpop.f32.mrf.mxu2 }
 0x1ff   : > { %v1363_v35 = vadd.f32 %v3395_v25, %v1362_v33  ;;  %v1234_v38 = vadd.f32 %v1233_v32, %v1144_v31 }
 0x201   : > { %v1427_v41 = vmax.f32 %v1363_v35, 0.0 }
 0x204   : > { %v1146_v34 = vpop.f32.mrf.mxu0 }
 0x206   : > { %v1235_v36 = vpop.f32.mrf.mxu1  ;;  %v1364_v37 = vpop.f32.mrf.mxu2 }
 0x207   : > { %v1236_v39 = vadd.f32 %v1235_v36, %v1146_v34  ;;  %v1365_v40 = vadd.f32 %v3395_v25, %v1364_v37 }
 0x209   : > { %v1257_v42 = vpack.c.bf16 %v1236_v39, %v1234_v38  ;;  %v1428_v43 = vmax.f32 %v1365_v40, 0.0 }
 0x20b   : > { %2570 = vmatmul.msk.bf16.gmra.mxu2 %vm1279_vm2, %v1257_v42  ;;  %v1454_v44 = vpack.c.bf16 %v1428_v43, %v1427_v41 }
 0x20c   : > { %v1149_v45 = vpop.f32.mrf.mxu0 }
 0x20d   : > { %1566 = vmatmul.bf16.gmra.mxu3 %v1454_v44 }
 0x20e   : > { %v1238_v46 = vpop.f32.mrf.mxu1  ;;  %v1367_v47 = vpop.f32.mrf.mxu2 }
 0x20f   : > { %v1368_v48 = vadd.f32 %v3395_v25, %v1367_v47  ;;  %v1239_v52 = vadd.f32 %v1238_v46, %v1149_v45 }
 0x211   : > { %v1429_v56 = vmax.f32 %v1368_v48, 0.0 }
 0x214   : > { %v1151_v49 = vpop.f32.mrf.mxu0 }
 0x216   : > { %v1240_v50 = vpop.f32.mrf.mxu1  ;;  %v1369_v51 = vpop.f32.mrf.mxu2 }
 0x217   : > { %v1241_v53 = vadd.f32 %v1240_v50, %v1151_v49  ;;  %v1370_v54 = vadd.f32 %v3395_v25, %v1369_v51 }
 0x219   : > { %v1258_v57 = vpack.c.bf16 %v1241_v53, %v1239_v52  ;;  %v1430_v58 = vmax.f32 %v1370_v54, 0.0 }
 0x21b   : > { %2571 = vmatmul.msk.bf16.gmra.mxu2 %vm1279_vm2, %v1258_v57  ;;  %v1455_v60 = vpack.c.bf16 %v1430_v58, %v1429_v56 }
 0x21d   : > { %1571 = vmatmul.bf16.gmra.mxu3 %v1455_v60 }
 0x21e   : > { %v1372_v61 = vpop.f32.mrf.mxu2 }
 0x21f   : > { %v1373_v63 = vadd.f32 %v3395_v25, %v1372_v61 }
 0x221   : > { %v1431_v2 = vmax.f32 %v1373_v63, 0.0 }
 0x226   : > { %v1374_v0 = vpop.f32.mrf.mxu2 }
 0x227   : > { %v1375_v1 = vadd.f32 %v3395_v25, %v1374_v0 }
 0x229   : > { %v1432_v3 = vmax.f32 %v1375_v1, 0.0 }
 0x22b   : > { %v1456_v62 = vpack.c.bf16 %v1432_v3, %v1431_v2 }
 0x22d   : > { %1576 = vmatmul.bf16.gmra.mxu3 %v1456_v62 }
 0x22e   : > { %v1377_v4 = vpop.f32.mrf.mxu2 }
 0x22f   : > { %v1378_v5 = vadd.f32 %v3395_v25, %v1377_v4 }
 0x231   : > { %v1433_v59 = vmax.f32 %v1378_v5, 0.0 }
 0x236   : > { %v1379_v7 = vpop.f32.mrf.mxu2 }
 0x237   : > { %v1380_v8 = vadd.f32 %v3395_v25, %v1379_v7 }
 0x239   : > { %v1434_v9 = vmax.f32 %v1380_v8, 0.0 }
 0x23b   : > { %v1457_v10 = vpack.c.bf16 %v1434_v9, %v1433_v59 }
 0x23d   : > { %1581 = vmatmul.bf16.gmra.mxu3 %v1457_v10 }
 0x23e   : > { %v1382_v6 = vpop.f32.mrf.mxu2 }
 0x23f   : > { %v1383_v15 = vadd.f32 %v3395_v25, %v1382_v6 }
 0x240   : > { %v1542_v13 = vpop.f32.mrf.mxu3 }
 0x241   : > { %v1543_v14 = vadd.f32 %v3425_v11, %v1542_v13  ;;  %v1435_v19 = vmax.f32 %v1383_v15, 0.0 }
 0x243   : > { %v2604_v12 = vmul.f32 -1.442695, %v1543_v14 }
 0x245   : > { %2716 = vpow2.f32 %v2604_v12 }
 0x246   : > { %v1384_v16 = vpop.f32.mrf.mxu2 }
 0x247   : > { %v1385_v17 = vadd.f32 %v3395_v25, %v1384_v16 }
 0x248   : > { %v1544_v18 = vpop.f32.mrf.mxu3 }
 0x249   : > { %v1436_v20 = vmax.f32 %v1385_v17, 0.0  ;;  %v1545_v21 = vadd.f32 %v3425_v11, %v1544_v18 }
 0x24b   : > { %v2717_v22 = vpop.eup %2716  ;;  %v2605_v23 = vmul.f32 -1.442695, %v1545_v21  ;;  %v1458_v24 = vpack.c.bf16 %v1436_v20, %v1435_v19 }
 0x24c   : > { %v1718_v26 = vadd.f32 1.0, %v2717_v22 }
 0x24d   : > { %2718 = vpow2.f32 %v2605_v23  ;;  %1586 = vmatmul.bf16.gmra.mxu3 %v1458_v24 }
 0x24e   : > { %2720 = vrcp.f32 %v1718_v26  ;;  %v1387_v27 = vpop.f32.mrf.mxu2  ;;  %v1761_v41 = vand.u32 2147483648, %v1718_v26  ;;  %v1759_v45 = vand.u32 2147483647, %v1718_v26  ;;  %vm1755_vm2 = vweird.f32 %v1718_v26 }
 0x24f   : > { %v1388_v34 = vadd.f32 %v3395_v25, %v1387_v27 }
 0x250   : > { %v1547_v28 = vpop.f32.mrf.mxu3  ;;  %v1762_v54 = vor.u32 1.1754944e-38, %v1761_v41  ;;  %vm1760_vm7 = vcmp.eq.f32.partialorder %v1759_v45, 8.507059e+37 }
 0x251   : > { %v1548_v29 = vadd.f32 %v3425_v11, %v1547_v28  ;;  %v1437_v39 = vmax.f32 %v1388_v34, 0.0 }
 0x253   : > { %v2719_v30 = vpop.eup %2718  ;;  %v2606_v31 = vmul.f32 -1.442695, %v1548_v29 }
 0x254   : > { %v2721_v32 = vpop.eup %2720  ;;  %v1719_v33 = vadd.f32 1.0, %v2719_v30 }
 0x255   : > { %2722 = vpow2.f32 %v2606_v31  ;;  %v1751_v35 = vmul.f32 %v2721_v32, %v1718_v26  ;;  %vm1756_vm14 = vweird.f32 %v2721_v32 }
 0x256   : > { %2724 = vrcp.f32 %v1719_v33  ;;  %v1389_v36 = vpop.f32.mrf.mxu2  ;;  %vm1757_vm6 = vmor %vm1755_vm2, %vm1756_vm14  ;;  %v1776_v0 = vand.u32 2147483648, %v1719_v33  ;;  %v1774_v1 = vand.u32 2147483647, %v1719_v33  ;;  %vm1770_vm9 = vweird.f32 %v1719_v33 }
 0x257   : > { %v1390_v37 = vadd.f32 %v3395_v25, %v1389_v36  ;;  %v1752_v38 = vsub.f32 1.0, %v1751_v35 }
 0x258   : > { %v1549_v40 = vpop.f32.mrf.mxu3  ;;  %v1777_v9 = vor.u32 1.1754944e-38, %v1776_v0  ;;  %vm1775_vm11 = vcmp.eq.f32.partialorder %v1774_v1, 8.507059e+37 }
 0x259   : > { %v1438_v42 = vmax.f32 %v1390_v37, 0.0  ;;  %v1550_v43 = vadd.f32 %v3425_v11, %v1549_v40  ;;  %v1753_v44 = vmul.f32 %v2721_v32, %v1752_v38 }
 0x25b   : > { %v2723_v46 = vpop.eup %2722  ;;  %v2607_v47 = vmul.f32 -1.442695, %v1550_v43  ;;  %v1459_v48 = vpack.c.bf16 %v1438_v42, %v1437_v39  ;;  %v1754_v49 = vadd.f32 %v2721_v32, %v1753_v44 }
 0x25c   : > { %v2725_v50 = vpop.eup %2724  ;;  %v1720_v51 = vadd.f32 1.0, %v2723_v46 }
 0x25d   : > { %2726 = vpow2.f32 %v2607_v47  ;;  %1591 = vmatmul.bf16.gmra.mxu3 %v1459_v48  ;;  %v1766_v52 = vmul.f32 %v2725_v50, %v1719_v33  ;;  %v1758_v53 = vsel %vm1757_vm6, %v2721_v32, %v1754_v49  ;;  %vm1771_vm8 = vweird.f32 %v2725_v50 }
 0x25e   : > { %2728 = vrcp.f32 %v1720_v51  ;;  %v1392_v56 = vpop.f32.mrf.mxu2  ;;  %v1763_v58 = vsel %vm1760_vm7, %v1762_v54, %v1758_v53  ;;  %vm1772_vm10 = vmor %vm1770_vm9, %vm1771_vm8  ;;  %v1791_v16 = vand.u32 2147483648, %v1720_v51  ;;  %v1789_v20 = vand.u32 2147483647, %v1720_v51 }
 0x25f   : > { %v1767_v57 = vsub.f32 1.0, %v1766_v52  ;;  %2284 = vst [vmem:[%s3439_s11] sm:$0xff] %v1763_v58  ;;  %v1393_v7 = vadd.f32 %v3395_v25, %v1392_v56  ;;  %vm1785_vm13 = vweird.f32 %v1720_v51 }
 0x260   : > { %v1552_v60 = vpop.f32.mrf.mxu3  ;;  %v1792_v30 = vor.u32 1.1754944e-38, %v1791_v16  ;;  %vm1790_vm0 = vcmp.eq.f32.partialorder %v1789_v20, 8.507059e+37 }
 0x261   : > { %v1553_v61 = vadd.f32 %v3425_v11, %v1552_v60  ;;  %v1768_v63 = vmul.f32 %v2725_v50, %v1767_v57  ;;  %v1439_v12 = vmax.f32 %v1393_v7, 0.0 }
 0x263   : > { %v2727_v2 = vpop.eup %2726  ;;  %v2608_v3 = vmul.f32 -1.442695, %v1553_v61  ;;  %v1769_v62 = vadd.f32 %v2725_v50, %v1768_v63 }
 0x264   : > { %v2729_v4 = vpop.eup %2728  ;;  %v1721_v5 = vadd.f32 1.0, %v2727_v2 }
 0x265   : > { %2730 = vpow2.f32 %v2608_v3  ;;  %v1781_v8 = vmul.f32 %v2729_v4, %v1720_v51  ;;  %v1773_v59 = vsel %vm1772_vm10, %v2725_v50, %v1769_v62  ;;  %vm1786_vm12 = vweird.f32 %v2729_v4 }
 0x266   : > { %2732 = vrcp.f32 %v1721_v5  ;;  %v1394_v10 = vpop.f32.mrf.mxu2  ;;  %v3445_v14 = vsel %vm1775_vm11, %v1777_v9, %v1773_v59  ;;  %vm1787_vm15 = vmor %vm1785_vm13, %vm1786_vm12  ;;  %v1806_v37 = vand.u32 2147483648, %v1721_v5  ;;  %v1804_v38 = vand.u32 2147483647, %v1721_v5 }
 0x267   : > { %v1395_v6 = vadd.f32 %v3395_v25, %v1394_v10  ;;  %v1782_v13 = vsub.f32 1.0, %v1781_v8  ;;  %2285 = vst [vmem:[%s3439_s11 + $0x8] sm:$0xff] %v3445_v14  ;;  %vm1800_vm3 = vweird.f32 %v1721_v5 }
 0x268   : > { %v1554_v15 = vpop.f32.mrf.mxu3  ;;  %v1807_v47 = vor.u32 1.1754944e-38, %v1806_v37  ;;  %vm1805_vm5 = vcmp.eq.f32.partialorder %v1804_v38, 8.507059e+37 }
 0x269   : > { %v1440_v17 = vmax.f32 %v1395_v6, 0.0  ;;  %v1555_v18 = vadd.f32 %v3425_v11, %v1554_v15  ;;  %v1783_v19 = vmul.f32 %v2729_v4, %v1782_v13 }
 0x26b   : > { %v2731_v21 = vpop.eup %2730  ;;  %v2609_v22 = vmul.f32 -1.442695, %v1555_v18  ;;  %v1460_v23 = vpack.c.bf16 %v1440_v17, %v1439_v12  ;;  %v1784_v24 = vadd.f32 %v2729_v4, %v1783_v19 }
 0x26c   : > { %v2733_v26 = vpop.eup %2732  ;;  %v1722_v27 = vadd.f32 1.0, %v2731_v21 }
 0x26d   : > { %2734 = vpow2.f32 %v2609_v22  ;;  %1596 = vmatmul.bf16.gmra.mxu3 %v1460_v23  ;;  %v1796_v28 = vmul.f32 %v2733_v26, %v1721_v5  ;;  %v1788_v29 = vsel %vm1787_vm15, %v2729_v4, %v1784_v24  ;;  %vm1801_vm1 = vweird.f32 %v2733_v26 }
 0x26e   : > { %2736 = vrcp.f32 %v1722_v27  ;;  %v1397_v31 = vpop.f32.mrf.mxu2  ;;  %v3450_v33 = vsel %vm1790_vm0, %v1792_v30, %v1788_v29  ;;  %vm1802_vm4 = vmor %vm1800_vm3, %vm1801_vm1  ;;  %v1821_v54 = vand.u32 2147483648, %v1722_v27  ;;  %v1819_v60 = vand.u32 2147483647, %v1722_v27 }
 0x26f   : > { %v1797_v32 = vsub.f32 1.0, %v1796_v28  ;;  %2286 = vst [vmem:[%s3439_s11 + $0x10] sm:$0xff] %v3450_v33  ;;  %v1398_v44 = vadd.f32 %v3395_v25, %v1397_v31  ;;  %vm1815_vm2 = vweird.f32 %v1722_v27 }
 0x270   : > { %v1557_v34 = vpop.f32.mrf.mxu3  ;;  %v1822_v5 = vor.u32 1.1754944e-38, %v1821_v54  ;;  %vm1820_vm7 = vcmp.eq.f32.partialorder %v1819_v60, 8.507059e+37 }
 0x271   : > { %v1558_v35 = vadd.f32 %v3425_v11, %v1557_v34  ;;  %v1798_v36 = vmul.f32 %v2733_v26, %v1797_v32  ;;  %v1441_v52 = vmax.f32 %v1398_v44, 0.0 }
 0x273   : > { %v2735_v39 = vpop.eup %2734  ;;  %v2610_v40 = vmul.f32 -1.442695, %v1558_v35  ;;  %v1799_v41 = vadd.f32 %v2733_v26, %v1798_v36 }
 0x274   : > { %v2737_v42 = vpop.eup %2736  ;;  %v1723_v43 = vadd.f32 1.0, %v2735_v39 }
 0x275   : > { %2738 = vpow2.f32 %v2610_v40  ;;  %v1811_v45 = vmul.f32 %v2737_v42, %v1722_v27  ;;  %v1803_v46 = vsel %vm1802_vm4, %v2733_v26, %v1799_v41  ;;  %vm1816_vm14 = vweird.f32 %v2737_v42 }
 0x276   : > { %2740 = vrcp.f32 %v1723_v43  ;;  %v1399_v48 = vpop.f32.mrf.mxu2  ;;  %v3457_v51 = vsel %vm1805_vm5, %v1807_v47, %v1803_v46  ;;  %vm1817_vm6 = vmor %vm1815_vm2, %vm1816_vm14  ;;  %v1836_v13 = vand.u32 2147483648, %v1723_v43  ;;  %v1834_v12 = vand.u32 2147483647, %v1723_v43 }
 0x277   : > { %v1400_v49 = vadd.f32 %v3395_v25, %v1399_v48  ;;  %v1812_v50 = vsub.f32 1.0, %v1811_v45  ;;  %2287 = vst [vmem:[%s3439_s11 + $0x18] sm:$0xff] %v3457_v51  ;;  %vm1830_vm9 = vweird.f32 %v1723_v43 }
 0x278   : > { %v1559_v53 = vpop.f32.mrf.mxu3  ;;  %v1837_v23 = vor.u32 1.1754944e-38, %v1836_v13  ;;  %vm1835_vm11 = vcmp.eq.f32.partialorder %v1834_v12, 8.507059e+37 }
 0x279   : > { %v1442_v56 = vmax.f32 %v1400_v49, 0.0  ;;  %v1560_v57 = vadd.f32 %v3425_v11, %v1559_v53  ;;  %v1813_v58 = vmul.f32 %v2737_v42, %v1812_v50 }
 0x27b   : > { %v2739_v61 = vpop.eup %2738  ;;  %v1461_v63 = vpack.c.bf16 %v1442_v56, %v1441_v52  ;;  %v2611_v0 = vmul.f32 -1.442695, %v1560_v57  ;;  %v1814_v1 = vadd.f32 %v2737_v42, %v1813_v58 }
 0x27c   : > { %v2741_v2 = vpop.eup %2740  ;;  %v1724_v3 = vadd.f32 1.0, %v2739_v61 }
 0x27d   : > { %2742 = vpow2.f32 %v2611_v0  ;;  %1601 = vmatmul.bf16.gmra.mxu3 %v1461_v63  ;;  %v1826_v62 = vmul.f32 %v2741_v2, %v1723_v43  ;;  %v1818_v4 = vsel %vm1817_vm6, %v2737_v42, %v1814_v1  ;;  %vm1831_vm8 = vweird.f32 %v2741_v2 }
 0x27e   : > { %2744 = vrcp.f32 %v1724_v3  ;;  %v1402_v7 = vpop.f32.mrf.mxu2  ;;  %v3462_v59 = vsel %vm1820_vm7, %v1822_v5, %v1818_v4  ;;  %vm1832_vm10 = vmor %vm1830_vm9, %vm1831_vm8  ;;  %v1851_v31 = vand.u32 2147483648, %v1724_v3  ;;  %v1849_v36 = vand.u32 2147483647, %v1724_v3 }
 0x27f   : > { %v1827_v8 = vsub.f32 1.0, %v1826_v62  ;;  %2288 = vst [vmem:[%s3439_s11 + $0x20] sm:$0xff] %v3462_v59  ;;  %v1403_v20 = vadd.f32 %v3395_v25, %v1402_v7  ;;  %vm1845_vm13 = vweird.f32 %v1724_v3 }
 0x280   : > { %v1562_v9 = vpop.f32.mrf.mxu3  ;;  %v1852_v45 = vor.u32 1.1754944e-38, %v1851_v31  ;;  %vm1850_vm0 = vcmp.eq.f32.partialorder %v1849_v36, 8.507059e+37 }
 0x281   : > { %v1563_v10 = vadd.f32 %v3425_v11, %v1562_v9  ;;  %v1828_v6 = vmul.f32 %v2741_v2, %v1827_v8  ;;  %v1443_v29 = vmax.f32 %v1403_v20, 0.0 }
 0x283   : > { %v2743_v15 = vpop.eup %2742  ;;  %v2612_v16 = vmul.f32 -1.442695, %v1563_v10  ;;  %v1829_v17 = vadd.f32 %v2741_v2, %v1828_v6 }
 0x284   : > { %v2745_v18 = vpop.eup %2744  ;;  %v1725_v19 = vadd.f32 1.0, %v2743_v15 }
 0x285   : > { %2746 = vpow2.f32 %v2612_v16  ;;  %v1841_v21 = vmul.f32 %v2745_v18, %v1724_v3  ;;  %v1833_v22 = vsel %vm1832_vm10, %v2741_v2, %v1829_v17  ;;  %vm1846_vm12 = vweird.f32 %v2745_v18 }
 0x286   : > { %2748 = vrcp.f32 %v1725_v19  ;;  %v1404_v24 = vpop.f32.mrf.mxu2  ;;  %v3469_v28 = vsel %vm1835_vm11, %v1837_v23, %v1833_v22  ;;  %vm1847_vm15 = vmor %vm1845_vm13, %vm1846_vm12  ;;  %v1866_v53 = vand.u32 2147483648, %v1725_v19  ;;  %v1864_v54 = vand.u32 2147483647, %v1725_v19 }
 0x287   : > { %v1405_v26 = vadd.f32 %v3395_v25, %v1404_v24  ;;  %v1842_v27 = vsub.f32 1.0, %v1841_v21  ;;  %2289 = vst [vmem:[%s3439_s11 + $0x28] sm:$0xff] %v3469_v28  ;;  %vm1860_vm3 = vweird.f32 %v1725_v19 }
 0x288   : > { %v1564_v30 = vpop.f32.mrf.mxu3  ;;  %v1867_v2 = vor.u32 1.1754944e-38, %v1866_v53  ;;  %vm1865_vm5 = vcmp.eq.f32.partialorder %v1864_v54, 8.507059e+37 }
 0x289   : > { %v1444_v32 = vmax.f32 %v1405_v26, 0.0  ;;  %v1565_v34 = vadd.f32 %v3425_v11, %v1564_v30  ;;  %v1843_v35 = vmul.f32 %v2745_v18, %v1842_v27 }
 0x28b   : > { %v2747_v37 = vpop.eup %2746  ;;  %v1462_v38 = vpack.c.bf16 %v1444_v32, %v1443_v29  ;;  %v2613_v39 = vmul.f32 -1.442695, %v1565_v34  ;;  %v1844_v40 = vadd.f32 %v2745_v18, %v1843_v35 }
 0x28c   : > { %v2749_v41 = vpop.eup %2748  ;;  %v1726_v42 = vadd.f32 1.0, %v2747_v37 }
 0x28d   : > { %2750 = vpow2.f32 %v2613_v39  ;;  %1606 = vmatmul.bf16.gmra.mxu3 %v1462_v38  ;;  %v1856_v43 = vmul.f32 %v2749_v41, %v1725_v19  ;;  %v1848_v44 = vsel %vm1847_vm15, %v2745_v18, %v1844_v40  ;;  %vm1861_vm1 = vweird.f32 %v2749_v41 }
 0x28e   : > { %2752 = vrcp.f32 %v1726_v42  ;;  %v1407_v46 = vpop.f32.mrf.mxu2  ;;  %v3474_v48 = vsel %vm1850_vm0, %v1852_v45, %v1848_v44  ;;  %vm1862_vm4 = vmor %vm1860_vm3, %vm1861_vm1  ;;  %v1881_v9 = vand.u32 2147483648, %v1726_v42  ;;  %v1879_v12 = vand.u32 2147483647, %v1726_v42 }
 0x28f   : > { %v1857_v47 = vsub.f32 1.0, %v1856_v43  ;;  %2290 = vst [vmem:[%s3439_s11 + $0x30] sm:$0xff] %v3474_v48  ;;  %v1408_v63 = vadd.f32 %v3395_v25, %v1407_v46  ;;  %vm1875_vm2 = vweird.f32 %v1726_v42 }
 0x290   : > { %v1567_v49 = vpop.f32.mrf.mxu3  ;;  %v1882_v23 = vor.u32 1.1754944e-38, %v1881_v9  ;;  %vm1880_vm7 = vcmp.eq.f32.partialorder %v1879_v12, 8.507059e+37 }
 0x291   : > { %v1568_v50 = vadd.f32 %v3425_v11, %v1567_v49  ;;  %v1858_v52 = vmul.f32 %v2749_v41, %v1857_v47  ;;  %v1445_v7 = vmax.f32 %v1408_v63, 0.0 }
 0x293   : > { %v2751_v56 = vpop.eup %2750  ;;  %v2614_v57 = vmul.f32 -1.442695, %v1568_v50  ;;  %v1859_v58 = vadd.f32 %v2749_v41, %v1858_v52 }
 0x294   : > { %v2753_v60 = vpop.eup %2752  ;;  %v1727_v61 = vadd.f32 1.0, %v2751_v56 }
 0x295   : > { %2754 = vpow2.f32 %v2614_v57  ;;  %v1871_v0 = vmul.f32 %v2753_v60, %v1726_v42  ;;  %v1863_v1 = vsel %vm1862_vm4, %v2749_v41, %v1859_v58  ;;  %vm1876_vm14 = vweird.f32 %v2753_v60 }
 0x296   : > { %2756 = vrcp.f32 %v1727_v61  ;;  %v1409_v3 = vpop.f32.mrf.mxu2  ;;  %v3481_v5 = vsel %vm1865_vm5, %v1867_v2, %v1863_v1  ;;  %vm1877_vm6 = vmor %vm1875_vm2, %vm1876_vm14  ;;  %v1896_v32 = vand.u32 2147483648, %v1727_v61  ;;  %v1894_v34 = vand.u32 2147483647, %v1727_v61 }
 0x297   : > { %v1410_v62 = vadd.f32 %v3395_v25, %v1409_v3  ;;  %v1872_v4 = vsub.f32 1.0, %v1871_v0  ;;  %2291 = vst [vmem:[%s3439_s11 + $0x38] sm:$0xff] %v3481_v5  ;;  %vm1890_vm9 = vweird.f32 %v1727_v61 }
 0x298   : > { %v1569_v8 = vpop.f32.mrf.mxu3  ;;  %v1897_v43 = vor.u32 1.1754944e-38, %v1896_v32  ;;  %vm1895_vm11 = vcmp.eq.f32.partialorder %v1894_v34, 8.507059e+37 }
 0x299   : > { %v1446_v10 = vmax.f32 %v1410_v62, 0.0  ;;  %v1570_v6 = vadd.f32 %v3425_v11, %v1569_v8  ;;  %v1873_v13 = vmul.f32 %v2753_v60, %v1872_v4 }
 0x29b   : > { %v2755_v15 = vpop.eup %2754  ;;  %v1463_v16 = vpack.c.bf16 %v1446_v10, %v1445_v7  ;;  %v2615_v17 = vmul.f32 -1.442695, %v1570_v6  ;;  %v1874_v18 = vadd.f32 %v2753_v60, %v1873_v13 }
 0x29c   : > { %v2757_v19 = vpop.eup %2756  ;;  %v1728_v20 = vadd.f32 1.0, %v2755_v15 }
 0x29d   : > { %2758 = vpow2.f32 %v2615_v17  ;;  %1611 = vmatmul.bf16.gmra.mxu3 %v1463_v16  ;;  %v1886_v21 = vmul.f32 %v2757_v19, %v1727_v61  ;;  %v1878_v22 = vsel %vm1877_vm6, %v2753_v60, %v1874_v18  ;;  %vm1891_vm8 = vweird.f32 %v2757_v19 }
 0x29e   : > { %2760 = vrcp.f32 %v1728_v20  ;;  %v1412_v24 = vpop.f32.mrf.mxu2  ;;  %v3486_v27 = vsel %vm1880_vm7, %v1882_v23, %v1878_v22  ;;  %vm1892_vm10 = vmor %vm1890_vm9, %vm1891_vm8  ;;  %v1911_v52 = vand.u32 2147483648, %v1728_v20  ;;  %v1909_v57 = vand.u32 2147483647, %v1728_v20 }
 0x29f   : > { %v1887_v26 = vsub.f32 1.0, %v1886_v21  ;;  %2292 = vst [vmem:[%s3439_s11 + $0x40] sm:$0xff] %v3486_v27  ;;  %v1413_v40 = vadd.f32 %v3395_v25, %v1412_v24  ;;  %vm1905_vm13 = vweird.f32 %v1728_v20 }
 0x2a0   : > { %v1572_v29 = vpop.f32.mrf.mxu3  ;;  %v1912_v3 = vor.u32 1.1754944e-38, %v1911_v52  ;;  %vm1910_vm0 = vcmp.eq.f32.partialorder %v1909_v57, 8.507059e+37 }
 0x2a1   : > { %v1573_v30 = vadd.f32 %v3425_v11, %v1572_v29  ;;  %v1888_v31 = vmul.f32 %v2757_v19, %v1887_v26  ;;  %v1447_v49 = vmax.f32 %v1413_v40, 0.0 }
 0x2a3   : > { %v2759_v35 = vpop.eup %2758  ;;  %v2616_v36 = vmul.f32 -1.442695, %v1573_v30  ;;  %v1889_v37 = vadd.f32 %v2757_v19, %v1888_v31 }
 0x2a4   : > { %v2761_v38 = vpop.eup %2760  ;;  %v1729_v39 = vadd.f32 1.0, %v2759_v35 }
 0x2a5   : > { %2762 = vpow2.f32 %v2616_v36  ;;  %v1901_v41 = vmul.f32 %v2761_v38, %v1728_v20  ;;  %v1893_v42 = vsel %vm1892_vm10, %v2757_v19, %v1889_v37  ;;  %vm1906_vm12 = vweird.f32 %v2761_v38 }
 0x2a6   : > { %2764 = vrcp.f32 %v1729_v39  ;;  %v1414_v44 = vpop.f32.mrf.mxu2  ;;  %v3493_v47 = vsel %vm1895_vm11, %v1897_v43, %v1893_v42  ;;  %vm1907_vm15 = vmor %vm1905_vm13, %vm1906_vm12  ;;  %v1926_v10 = vand.u32 2147483648, %v1729_v39  ;;  %v1924_v6 = vand.u32 2147483647, %v1729_v39 }
 0x2a7   : > { %v1415_v45 = vadd.f32 %v3395_v25, %v1414_v44  ;;  %v1902_v46 = vsub.f32 1.0, %v1901_v41  ;;  %2293 = vst [vmem:[%s3439_s11 + $0x48] sm:$0xff] %v3493_v47  ;;  %vm1920_vm3 = vweird.f32 %v1729_v39 }
 0x2a8   : > { %v1574_v50 = vpop.f32.mrf.mxu3  ;;  %v1927_v20 = vor.u32 1.1754944e-38, %v1926_v10  ;;  %vm1925_vm5 = vcmp.eq.f32.partialorder %v1924_v6, 8.507059e+37 }
 0x2a9   : > { %v1448_v53 = vmax.f32 %v1415_v45, 0.0  ;;  %v1575_v54 = vadd.f32 %v3425_v11, %v1574_v50  ;;  %v1903_v56 = vmul.f32 %v2761_v38, %v1902_v46 }
 0x2ab   : > { %v2763_v58 = vpop.eup %2762  ;;  %v1464_v60 = vpack.c.bf16 %v1448_v53, %v1447_v49  ;;  %v2617_v61 = vmul.f32 -1.442695, %v1575_v54  ;;  %v1904_v63 = vadd.f32 %v2761_v38, %v1903_v56 }
 0x2ac   : > { %v2765_v25 = vpop.eup %2764  ;;  %v1730_v0 = vadd.f32 1.0, %v2763_v58 }
 0x2ad   : > { %2766 = vpow2.f32 %v2617_v61  ;;  %1616 = vmatmul.bf16.gmra.mxu3 %v1464_v60  ;;  %v1916_v1 = vmul.f32 %v2765_v25, %v1729_v39  ;;  %v1908_v2 = vsel %vm1907_vm15, %v2761_v38, %v1904_v63  ;;  %vm1921_vm1 = vweird.f32 %v2765_v25 }
 0x2ae   : > { %2768 = vrcp.f32 %v1730_v0  ;;  %v3498_v4 = vsel %vm1910_vm0, %v1912_v3, %v1908_v2  ;;  %vm1922_vm4 = vmor %vm1920_vm3, %vm1921_vm1  ;;  %v1941_v29 = vand.u32 2147483648, %v1730_v0  ;;  %v1939_v30 = vand.u32 2147483647, %v1730_v0 }
 0x2af   : > { %v1917_v62 = vsub.f32 1.0, %v1916_v1  ;;  %2294 = vst [vmem:[%s3439_s11 + $0x50] sm:$0xff] %v3498_v4  ;;  %vm1935_vm2 = vweird.f32 %v1730_v0 }
 0x2b0   : > { %v1577_v7 = vpop.f32.mrf.mxu3  ;;  %v1942_v39 = vor.u32 1.1754944e-38, %v1941_v29  ;;  %vm1940_vm7 = vcmp.eq.f32.partialorder %v1939_v30, 8.507059e+37 }
 0x2b1   : > { %v1578_v8 = vadd.f32 %v3425_v11, %v1577_v7  ;;  %v1918_v9 = vmul.f32 %v2765_v25, %v1917_v62 }
 0x2b3   : > { %v2767_v13 = vpop.eup %2766  ;;  %v2618_v12 = vmul.f32 -1.442695, %v1578_v8  ;;  %v1919_v15 = vadd.f32 %v2765_v25, %v1918_v9 }
 0x2b4   : > { %v2769_v16 = vpop.eup %2768  ;;  %v1731_v17 = vadd.f32 1.0, %v2767_v13 }
 0x2b5   : > { %2770 = vpow2.f32 %v2618_v12  ;;  %v1931_v18 = vmul.f32 %v2769_v16, %v1730_v0  ;;  %v1923_v19 = vsel %vm1922_vm4, %v2765_v25, %v1919_v15  ;;  %vm1936_vm14 = vweird.f32 %v2769_v16 }
 0x2b6   : > { %2772 = vrcp.f32 %v1731_v17  ;;  %v3503_v22 = vsel %vm1925_vm5, %v1927_v20, %v1923_v19  ;;  %vm1937_vm6 = vmor %vm1935_vm2, %vm1936_vm14  ;;  %v1956_v45 = vand.u32 2147483648, %v1731_v17  ;;  %v1954_v46 = vand.u32 2147483647, %v1731_v17 }
 0x2b7   : > { %v1932_v21 = vsub.f32 1.0, %v1931_v18  ;;  %2295 = vst [vmem:[%s3439_s11 + $0x58] sm:$0xff] %v3503_v22  ;;  %vm1950_vm9 = vweird.f32 %v1731_v17 }
 0x2b8   : > { %v1579_v23 = vpop.f32.mrf.mxu3  ;;  %v1957_v58 = vor.u32 1.1754944e-38, %v1956_v45  ;;  %vm1955_vm11 = vcmp.eq.f32.partialorder %v1954_v46, 8.507059e+37 }
 0x2b9   : > { %v1580_v24 = vadd.f32 %v3425_v11, %v1579_v23  ;;  %v1933_v26 = vmul.f32 %v2769_v16, %v1932_v21 }
 0x2bb   : > { %v2771_v31 = vpop.eup %2770  ;;  %v2619_v32 = vmul.f32 -1.442695, %v1580_v24  ;;  %v1934_v34 = vadd.f32 %v2769_v16, %v1933_v26 }
 0x2bc   : > { %v2773_v35 = vpop.eup %2772  ;;  %v1732_v36 = vadd.f32 1.0, %v2771_v31 }
 0x2bd   : > { %2774 = vpow2.f32 %v2619_v32  ;;  %v1946_v37 = vmul.f32 %v2773_v35, %v1731_v17  ;;  %v1938_v38 = vsel %vm1937_vm6, %v2769_v16, %v1934_v34  ;;  %vm1951_vm8 = vweird.f32 %v2773_v35 }
 0x2be   : > { %2776 = vrcp.f32 %v1732_v36  ;;  %v3508_v41 = vsel %vm1940_vm7, %v1942_v39, %v1938_v38  ;;  %vm1952_vm10 = vmor %vm1950_vm9, %vm1951_vm8  ;;  %v1971_v25 = vand.u32 2147483648, %v1732_v36  ;;  %v1969_v2 = vand.u32 2147483647, %v1732_v36 }
 0x2bf   : > { %v1947_v40 = vsub.f32 1.0, %v1946_v37  ;;  %2296 = vst [vmem:[%s3439_s11 + $0x60] sm:$0xff] %v3508_v41  ;;  %vm1965_vm13 = vweird.f32 %v1732_v36 }
 0x2c0   : > { %v1582_v42 = vpop.f32.mrf.mxu3  ;;  %v1972_v10 = vor.u32 1.1754944e-38, %v1971_v25  ;;  %vm1970_vm0 = vcmp.eq.f32.partialorder %v1969_v2, 8.507059e+37 }
 0x2c1   : > { %v1583_v43 = vadd.f32 %v3425_v11, %v1582_v42  ;;  %v1948_v44 = vmul.f32 %v2773_v35, %v1947_v40 }
 0x2c3   : > { %v2775_v49 = vpop.eup %2774  ;;  %v2620_v50 = vmul.f32 -1.442695, %v1583_v43  ;;  %v1949_v52 = vadd.f32 %v2773_v35, %v1948_v44 }
 0x2c4   : > { %v2777_v53 = vpop.eup %2776  ;;  %v1733_v54 = vadd.f32 1.0, %v2775_v49 }
 0x2c5   : > { %2778 = vpow2.f32 %v2620_v50  ;;  %v1961_v56 = vmul.f32 %v2777_v53, %v1732_v36  ;;  %v1953_v57 = vsel %vm1952_vm10, %v2773_v35, %v1949_v52  ;;  %vm1966_vm12 = vweird.f32 %v2777_v53 }
 0x2c6   : > { %2780 = vrcp.f32 %v1733_v54  ;;  %v3513_v61 = vsel %vm1955_vm11, %v1957_v58, %v1953_v57  ;;  %vm1967_vm15 = vmor %vm1965_vm13, %vm1966_vm12  ;;  %v1986_v17 = vand.u32 2147483648, %v1733_v54  ;;  %v1984_v20 = vand.u32 2147483647, %v1733_v54 }
 0x2c7   : > { %v1962_v60 = vsub.f32 1.0, %v1961_v56  ;;  %2297 = vst [vmem:[%s3439_s11 + $0x68] sm:$0xff] %v3513_v61  ;;  %vm1980_vm3 = vweird.f32 %v1733_v54 }
 0x2c8   : > { %v1584_v63 = vpop.f32.mrf.mxu3  ;;  %v1987_v30 = vor.u32 1.1754944e-38, %v1986_v17  ;;  %vm1985_vm5 = vcmp.eq.f32.partialorder %v1984_v20, 8.507059e+37 }
 0x2c9   : > { %v1585_v0 = vadd.f32 %v3425_v11, %v1584_v63  ;;  %v1963_v1 = vmul.f32 %v2777_v53, %v1962_v60 }
 0x2cb   : > { %v2779_v3 = vpop.eup %2778  ;;  %v2621_v62 = vmul.f32 -1.442695, %v1585_v0  ;;  %v1964_v7 = vadd.f32 %v2777_v53, %v1963_v1 }
 0x2cc   : > { %v2781_v8 = vpop.eup %2780  ;;  %v1734_v9 = vadd.f32 1.0, %v2779_v3 }
 0x2cd   : > { %2782 = vpow2.f32 %v2621_v62  ;;  %v1976_v6 = vmul.f32 %v2781_v8, %v1733_v54  ;;  %v1968_v13 = vsel %vm1967_vm15, %v2777_v53, %v1964_v7  ;;  %vm1981_vm1 = vweird.f32 %v2781_v8 }
 0x2ce   : > { %2784 = vrcp.f32 %v1734_v9  ;;  %v1973_v12 = vsel %vm1970_vm0, %v1972_v10, %v1968_v13  ;;  %vm1982_vm4 = vmor %vm1980_vm3, %vm1981_vm1  ;;  %v2001_v39 = vand.u32 2147483648, %v1734_v9  ;;  %v1999_v40 = vand.u32 2147483647, %v1734_v9 }
 0x2cf   : > { %v1977_v15 = vsub.f32 1.0, %v1976_v6  ;;  %2298 = vst [vmem:[%s3439_s11 + $0x70] sm:$0xff] %v1973_v12  ;;  %vm1995_vm2 = vweird.f32 %v1734_v9 }
 0x2d0   : > { %v1587_v16 = vpop.f32.mrf.mxu3  ;;  %v2002_v52 = vor.u32 1.1754944e-38, %v2001_v39  ;;  %vm2000_vm7 = vcmp.eq.f32.partialorder %v1999_v40, 8.507059e+37 }
 0x2d1   : > { %v1588_v18 = vadd.f32 %v3425_v11, %v1587_v16  ;;  %v1978_v19 = vmul.f32 %v2781_v8, %v1977_v15 }
 0x2d3   : > { %v2783_v21 = vpop.eup %2782  ;;  %v2622_v23 = vmul.f32 -1.442695, %v1588_v18  ;;  %v1979_v24 = vadd.f32 %v2781_v8, %v1978_v19 }
 0x2d4   : > { %v2785_v26 = vpop.eup %2784  ;;  %v1735_v29 = vadd.f32 1.0, %v2783_v21 }
 0x2d5   : > { %2786 = vpow2.f32 %v2622_v23  ;;  %v1983_v31 = vsel %vm1982_vm4, %v2781_v8, %v1979_v24  ;;  %v1991_v32 = vmul.f32 %v2785_v26, %v1734_v9  ;;  %vm1996_vm14 = vweird.f32 %v2785_v26 }
 0x2d6   : > { %2788 = vrcp.f32 %v1735_v29  ;;  %v1988_v34 = vsel %vm1985_vm5, %v1987_v30, %v1983_v31  ;;  %vm1997_vm6 = vmor %vm1995_vm2, %vm1996_vm14  ;;  %v2016_v60 = vand.u32 2147483648, %v1735_v29  ;;  %v2014_v63 = vand.u32 2147483647, %v1735_v29 }
 0x2d7   : > { %2233 = vmatpush.xpose.msrb.mxu1 %v1988_v34  ;;  %2299 = vst [vmem:[%s3439_s11 + $0x78] sm:$0xff] %v1988_v34  ;;  %v1992_v35 = vsub.f32 1.0, %v1991_v32  ;;  %vm2010_vm9 = vweird.f32 %v1735_v29 }
 0x2d8   : > { %v1589_v36 = vpop.f32.mrf.mxu3  ;;  %v2017_v7 = vor.u32 1.1754944e-38, %v2016_v60  ;;  %vm2015_vm11 = vcmp.eq.f32.partialorder %v2014_v63, 8.507059e+37 }
 0x2d9   : > { %v1590_v37 = vadd.f32 %v3425_v11, %v1589_v36  ;;  %v1993_v38 = vmul.f32 %v2785_v26, %v1992_v35 }
 0x2db   : > { %v2787_v42 = vpop.eup %2786  ;;  %v2623_v43 = vmul.f32 -1.442695, %v1590_v37  ;;  %2234 = vmatpush.xpose.msrb.mxu1 %v1973_v12  ;;  %v1994_v44 = vadd.f32 %v2785_v26, %v1993_v38 }
 0x2dc   : > { %v2789_v45 = vpop.eup %2788  ;;  %v1736_v46 = vadd.f32 1.0, %v2787_v42 }
 0x2dd   : > { %2790 = vpow2.f32 %v2623_v43  ;;  %v2006_v49 = vmul.f32 %v2789_v45, %v1735_v29  ;;  %v1998_v50 = vsel %vm1997_vm6, %v2785_v26, %v1994_v44  ;;  %vm2011_vm8 = vweird.f32 %v2789_v45 }
 0x2de   : > { %2792 = vrcp.f32 %v1736_v46  ;;  %v3523_v54 = vsel %vm2000_vm7, %v2002_v52, %v1998_v50  ;;  %vm2012_vm10 = vmor %vm2010_vm9, %vm2011_vm8  ;;  %v2031_v13 = vand.u32 2147483648, %v1736_v46  ;;  %v2029_v12 = vand.u32 2147483647, %v1736_v46 }
 0x2df   : > { %2235 = vmatpush.xpose.msrb.mxu1 %v3513_v61  ;;  %v2007_v53 = vsub.f32 1.0, %v2006_v49  ;;  %2300 = vst [vmem:[%s3439_s11 + $0x80] sm:$0xff] %v3523_v54  ;;  %vm2025_vm13 = vweird.f32 %v1736_v46 }
 0x2e0   : > { %v1592_v56 = vpop.f32.mrf.mxu3  ;;  %v2032_v21 = vor.u32 1.1754944e-38, %v2031_v13  ;;  %vm2030_vm0 = vcmp.eq.f32.partialorder %v2029_v12, 8.507059e+37 }
 0x2e1   : > { %v1593_v57 = vadd.f32 %v3425_v11, %v1592_v56  ;;  %v2008_v58 = vmul.f32 %v2789_v45, %v2007_v53 }
 0x2e3   : > { %v2791_v25 = vpop.eup %2790  ;;  %v2624_v0 = vmul.f32 -1.442695, %v1593_v57  ;;  %2236 = vmatpush.xpose.msrb.mxu1 %v3508_v41  ;;  %v2009_v1 = vadd.f32 %v2789_v45, %v2008_v58 }
 0x2e4   : > { %v2793_v61 = vpop.eup %2792  ;;  %v1737_v2 = vadd.f32 1.0, %v2791_v25 }
 0x2e5   : > { %2794 = vpow2.f32 %v2624_v0  ;;  %v2021_v3 = vmul.f32 %v2793_v61, %v1736_v46  ;;  %v2013_v62 = vsel %vm2012_vm10, %v2789_v45, %v2009_v1  ;;  %vm2026_vm12 = vweird.f32 %v2793_v61 }
 0x2e6   : > { %2796 = vrcp.f32 %v1737_v2  ;;  %v3530_v9 = vsel %vm2015_vm11, %v2017_v7, %v2013_v62  ;;  %vm2027_vm15 = vmor %vm2025_vm13, %vm2026_vm12  ;;  %v2046_v30 = vand.u32 2147483648, %v1737_v2  ;;  %v2044_v31 = vand.u32 2147483647, %v1737_v2 }
 0x2e7   : > { %2237 = vmatpush.xpose.msrb.mxu1 %v3503_v22  ;;  %v2022_v8 = vsub.f32 1.0, %v2021_v3  ;;  %2301 = vst [vmem:[%s3439_s11 + $0x88] sm:$0xff] %v3530_v9  ;;  %vm2040_vm3 = vweird.f32 %v1737_v2 }
 0x2e8   : > { %v1594_v10 = vpop.f32.mrf.mxu3  ;;  %v2047_v39 = vor.u32 1.1754944e-38, %v2046_v30  ;;  %vm2045_vm5 = vcmp.eq.f32.partialorder %v2044_v31, 8.507059e+37 }
 0x2e9   : > { %v1595_v41 = vadd.f32 %v3425_v11, %v1594_v10  ;;  %v2023_v6 = vmul.f32 %v2793_v61, %v2022_v8 }
 0x2eb   : > { %v2795_v15 = vpop.eup %2794  ;;  %v2625_v16 = vmul.f32 -1.442695, %v1595_v41  ;;  %2238 = vmatpush.xpose.msrb.mxu1 %v3498_v4  ;;  %v2024_v17 = vadd.f32 %v2793_v61, %v2023_v6 }
 0x2ec   : > { %v2797_v22 = vpop.eup %2796  ;;  %v1738_v18 = vadd.f32 1.0, %v2795_v15 }
 0x2ed   : > { %2798 = vpow2.f32 %v2625_v16  ;;  %v2036_v19 = vmul.f32 %v2797_v22, %v1737_v2  ;;  %v2028_v20 = vsel %vm2027_vm15, %v2793_v61, %v2024_v17  ;;  %vm2041_vm1 = vweird.f32 %v2797_v22 }
 0x2ee   : > { %2800 = vrcp.f32 %v1738_v18  ;;  %v3537_v24 = vsel %vm2030_vm0, %v2032_v21, %v2028_v20  ;;  %vm2042_vm4 = vmor %vm2040_vm3, %vm2041_vm1  ;;  %v2061_v45 = vand.u32 2147483648, %v1738_v18  ;;  %v2059_v46 = vand.u32 2147483647, %v1738_v18 }
 0x2ef   : > { %2239 = vmatpush.xpose.msrb.mxu1 %v3493_v47  ;;  %v2037_v23 = vsub.f32 1.0, %v2036_v19  ;;  %2302 = vst [vmem:[%s3439_s11 + $0x90] sm:$0xff] %v3537_v24  ;;  %vm2055_vm2 = vweird.f32 %v1738_v18 }
 0x2f0   : > { %v1597_v26 = vpop.f32.mrf.mxu3  ;;  %v2062_v58 = vor.u32 1.1754944e-38, %v2061_v45  ;;  %vm2060_vm7 = vcmp.eq.f32.partialorder %v2059_v46, 8.507059e+37 }
 0x2f1   : > { %v1598_v4 = vadd.f32 %v3425_v11, %v1597_v26  ;;  %v2038_v29 = vmul.f32 %v2797_v22, %v2037_v23 }
 0x2f3   : > { %v2799_v32 = vpop.eup %2798  ;;  %v2626_v34 = vmul.f32 -1.442695, %v1598_v4  ;;  %2240 = vmatpush.xpose.msrb.mxu1 %v3486_v27  ;;  %v2039_v35 = vadd.f32 %v2797_v22, %v2038_v29  ;;  %v3551_v27 = vld [vmem:[%s3676_s6] ss:$0 sm:$0xff] }
 0x2f4   : > { %v2801_v47 = vpop.eup %2800  ;;  %v1739_v36 = vadd.f32 1.0, %v2799_v32 }
 0x2f5   : > { %2802 = vpow2.f32 %v2626_v34  ;;  %v2051_v37 = vmul.f32 %v2801_v47, %v1738_v18  ;;  %v2043_v38 = vsel %vm2042_vm4, %v2797_v22, %v2039_v35  ;;  %vm2056_vm14 = vweird.f32 %v2801_v47 }
 0x2f6   : > { %2804 = vrcp.f32 %v1739_v36  ;;  %v3544_v40 = vsel %vm2045_vm5, %v2047_v39, %v2043_v38  ;;  %vm2057_vm6 = vmor %vm2055_vm2, %vm2056_vm14  ;;  %v2076_v1 = vand.u32 2147483648, %v1739_v36  ;;  %v2074_v61 = vand.u32 2147483647, %v1739_v36 }
 0x2f7   : > { %2241 = vmatpush.xpose.msrb.mxu1 %v3481_v5  ;;  %v2052_v11 = vsub.f32 1.0, %v2051_v37  ;;  %2303 = vst [vmem:[%s3439_s11 + $0x98] sm:$0xff] %v3544_v40  ;;  %vm2070_vm9 = vweird.f32 %v1739_v36 }
 0x2f8   : > { %v1599_v42 = vpop.f32.mrf.mxu3  ;;  %v2077_v41 = vor.u32 1.1754944e-38, %v2076_v1  ;;  %vm2075_vm11 = vcmp.eq.f32.partialorder %v2074_v61, 8.507059e+37 }
 0x2f9   : > { %v1600_v43 = vadd.f32 %v3551_v27, %v1599_v42  ;;  %v2053_v44 = vmul.f32 %v2801_v47, %v2052_v11 }
 0x2fb   : > { %v2803_v49 = vpop.eup %2802  ;;  %v2627_v50 = vmul.f32 -1.442695, %v1600_v43  ;;  %2242 = vmatpush.xpose.msrb.mxu1 %v3474_v48  ;;  %v2054_v5 = vadd.f32 %v2801_v47, %v2053_v44 }
 0x2fc   : > { %v2805_v52 = vpop.eup %2804  ;;  %v1740_v53 = vadd.f32 1.0, %v2803_v49 }
 0x2fd   : > { %2806 = vpow2.f32 %v2627_v50  ;;  %v2066_v56 = vmul.f32 %v2805_v52, %v1739_v36  ;;  %v2058_v57 = vsel %vm2057_vm6, %v2801_v47, %v2054_v5  ;;  %vm2071_vm8 = vweird.f32 %v2805_v52  ;;  %v2845_v36 = vld [vmem:[%s3439_s11] sm:$0xff] }
 0x2fe   : > { %2808 = vrcp.f32 %v1740_v53  ;;  %v3556_v63 = vsel %vm2060_vm7, %v2062_v58, %v2058_v57  ;;  %vm2072_vm10 = vmor %vm2070_vm9, %vm2071_vm8  ;;  %v2091_v16 = vand.u32 2147483648, %v1740_v53  ;;  %v2089_v17 = vand.u32 2147483647, %v1740_v53 }
 0x2ff   : > { %2243 = vmatpush.xpose.msrb.mxu1 %v3469_v28  ;;  %v2067_v60 = vsub.f32 1.0, %v2066_v56  ;;  %2304 = vst [vmem:[%s3439_s11 + $0xa0] sm:$0xff] %v3556_v63  ;;  %vm2085_vm13 = vweird.f32 %v1740_v53 }
 0x300   : > { %v1602_v25 = vpop.f32.mrf.mxu3  ;;  %v2092_v26 = vor.u32 1.1754944e-38, %v2091_v16  ;;  %vm2090_vm0 = vcmp.eq.f32.partialorder %v2089_v17, 8.507059e+37 }
 0x301   : > { %v1603_v48 = vadd.f32 %v3551_v27, %v1602_v25  ;;  %v2068_v0 = vmul.f32 %v2805_v52, %v2067_v60 }
 0x303   : > { %v2807_v2 = vpop.eup %2806  ;;  %v2628_v3 = vmul.f32 -1.442695, %v1603_v48  ;;  %2244 = vmatpush.xpose.msrb.mxu1 %v3462_v59  ;;  %v2069_v62 = vadd.f32 %v2805_v52, %v2068_v0 }
 0x304   : > { %v2809_v28 = vpop.eup %2808  ;;  %v1741_v7 = vadd.f32 1.0, %v2807_v2 }
 0x305   : > { %2810 = vpow2.f32 %v2628_v3  ;;  %v2081_v8 = vmul.f32 %v2809_v28, %v1740_v53  ;;  %v2073_v10 = vsel %vm2072_vm10, %v2805_v52, %v2069_v62  ;;  %vm2086_vm12 = vweird.f32 %v2809_v28 }
 0x306   : > { %2812 = vrcp.f32 %v1741_v7  ;;  %v3563_v13 = vsel %vm2075_vm11, %v2077_v41, %v2073_v10  ;;  %vm2087_vm15 = vmor %vm2085_vm13, %vm2086_vm12  ;;  %v2106_v32 = vand.u32 2147483648, %v1741_v7  ;;  %v2104_v34 = vand.u32 2147483647, %v1741_v7 }
 0x307   : > { %2245 = vmatpush.xpose.msrb.mxu1 %v3457_v51  ;;  %v2082_v6 = vsub.f32 1.0, %v2081_v8  ;;  %2305 = vst [vmem:[%s3439_s11 + $0xa8] sm:$0xff] %v3563_v13  ;;  %vm2100_vm3 = vweird.f32 %v1741_v7 }
 0x308   : > { %v1604_v12 = vpop.f32.mrf.mxu3  ;;  %v2107_v42 = vor.u32 1.1754944e-38, %v2106_v32  ;;  %vm2105_vm5 = vcmp.eq.f32.partialorder %v2104_v34, 8.507059e+37 }
 0x309   : > { %v1605_v59 = vadd.f32 %v3551_v27, %v1604_v12  ;;  %v2083_v15 = vmul.f32 %v2809_v28, %v2082_v6 }
 0x30b   : > { %v2811_v22 = vpop.eup %2810  ;;  %v2629_v18 = vmul.f32 -1.442695, %v1605_v59  ;;  %2246 = vmatpush.xpose.msrb.mxu1 %v3450_v33  ;;  %v2084_v19 = vadd.f32 %v2809_v28, %v2083_v15 }
 0x30c   : > { %v2813_v51 = vpop.eup %2812  ;;  %v1742_v20 = vadd.f32 1.0, %v2811_v22 }
 0x30d   : > { %2814 = vpow2.f32 %v2629_v18  ;;  %v2096_v21 = vmul.f32 %v2813_v51, %v1741_v7  ;;  %v2088_v23 = vsel %vm2087_vm15, %v2809_v28, %v2084_v19  ;;  %vm2101_vm1 = vweird.f32 %v2813_v51 }
 0x30e   : > { %2816 = vrcp.f32 %v1742_v20  ;;  %v3570_v29 = vsel %vm2090_vm0, %v2092_v26, %v2088_v23  ;;  %vm2102_vm4 = vmor %vm2100_vm3, %vm2101_vm1  ;;  %v2121_v50 = vand.u32 2147483648, %v1742_v20  ;;  %v2119_v5 = vand.u32 2147483647, %v1742_v20 }
 0x30f   : > { %2247 = vmatpush.xpose.msrb.mxu1 %v3445_v14  ;;  %v2097_v4 = vsub.f32 1.0, %v2096_v21  ;;  %2306 = vst [vmem:[%s3439_s11 + $0xb0] sm:$0xff] %v3570_v29  ;;  %vm2115_vm2 = vweird.f32 %v1742_v20 }
 0x310   : > { %v1607_v30 = vpop.f32.mrf.mxu3  ;;  %v2122_v48 = vor.u32 1.1754944e-38, %v2121_v50  ;;  %vm2120_vm7 = vcmp.eq.f32.partialorder %v2119_v5, 8.507059e+37 }
 0x311   : > { %v1608_v33 = vadd.f32 %v3551_v27, %v1607_v30  ;;  %v2098_v31 = vmul.f32 %v2813_v51, %v2097_v4 }
 0x313   : > { %v2815_v35 = vpop.eup %2814  ;;  %v2630_v47 = vmul.f32 -1.442695, %v1608_v33  ;;  %2248 = vmatpush.xpose.msrb.mxu1 %v2845_v36  ;;  %v2099_v37 = vadd.f32 %v2813_v51, %v2098_v31 }
 0x314   : > { %v2817_v14 = vpop.eup %2816  ;;  %v1743_v38 = vadd.f32 1.0, %v2815_v35 }
 0x315   : > { %2818 = vpow2.f32 %v2630_v47  ;;  %v2111_v39 = vmul.f32 %v2817_v14, %v1742_v20  ;;  %v2103_v11 = vsel %vm2102_vm4, %v2813_v51, %v2099_v37  ;;  %vm2116_vm14 = vweird.f32 %v2817_v14 }
 0x316   : > { %2820 = vrcp.f32 %v1743_v38  ;;  %v3576_v44 = vsel %vm2105_vm5, %v2107_v42, %v2103_v11  ;;  %vm2117_vm6 = vmor %vm2115_vm2, %vm2116_vm14  ;;  %v2136_v62 = vand.u32 2147483648, %v1743_v38  ;;  %v2134_v28 = vand.u32 2147483647, %v1743_v38 }
 0x317   : > { %v2112_v43 = vsub.f32 1.0, %v2111_v39  ;;  %2307 = vst [vmem:[%s3439_s11 + $0xb8] sm:$0xff] %v3576_v44  ;;  %vm2130_vm9 = vweird.f32 %v1743_v38 }
 0x318   : > { %v1609_v45 = vpop.f32.mrf.mxu3  ;;  %v2137_v15 = vor.u32 1.1754944e-38, %v2136_v62  ;;  %vm2135_vm11 = vcmp.eq.f32.partialorder %v2134_v28, 8.507059e+37 }
 0x319   : > { %v1610_v46 = vadd.f32 %v3551_v27, %v1609_v45  ;;  %v2113_v49 = vmul.f32 %v2817_v14, %v2112_v43 }
 0x31b   : > { %v2819_v52 = vpop.eup %2818  ;;  %v2631_v53 = vmul.f32 -1.442695, %v1610_v46  ;;  %v2114_v56 = vadd.f32 %v2817_v14, %v2113_v49 }
 0x31c   : > { %v2821_v57 = vpop.eup %2820  ;;  %v1744_v58 = vadd.f32 1.0, %v2819_v52 }
 0x31d   : > { %2822 = vpow2.f32 %v2631_v53  ;;  %v2126_v60 = vmul.f32 %v2821_v57, %v1743_v38  ;;  %v2118_v25 = vsel %vm2117_vm6, %v2817_v14, %v2114_v56  ;;  %vm2131_vm8 = vweird.f32 %v2821_v57 }
 0x31e   : > { %2824 = vrcp.f32 %v1744_v58  ;;  %v3581_v1 = vsel %vm2120_vm7, %v2122_v48, %v2118_v25  ;;  %vm2132_vm10 = vmor %vm2130_vm9, %vm2131_vm8  ;;  %v2151_v51 = vand.u32 2147483648, %v1744_v58  ;;  %v2149_v20 = vand.u32 2147483647, %v1744_v58 }
 0x31f   : > { %v2127_v0 = vsub.f32 1.0, %v2126_v60  ;;  %2308 = vst [vmem:[%s3439_s11 + $0xc0] sm:$0xff] %v3581_v1  ;;  %vm2145_vm13 = vweird.f32 %v1744_v58 }
 0x320   : > { %v1612_v61 = vpop.f32.mrf.mxu3  ;;  %v2152_v32 = vor.u32 1.1754944e-38, %v2151_v51  ;;  %vm2150_vm0 = vcmp.eq.f32.partialorder %v2149_v20, 8.507059e+37 }
 0x321   : > { %v1613_v2 = vadd.f32 %v3551_v27, %v1612_v61  ;;  %v2128_v3 = vmul.f32 %v2821_v57, %v2127_v0 }
 0x323   : > { %v2823_v7 = vpop.eup %2822  ;;  %v2632_v8 = vmul.f32 -1.442695, %v1613_v2  ;;  %v2129_v10 = vadd.f32 %v2821_v57, %v2128_v3 }
 0x324   : > { %v2825_v41 = vpop.eup %2824  ;;  %v1745_v6 = vadd.f32 1.0, %v2823_v7 }
 0x325   : > { %2826 = vpow2.f32 %v2632_v8  ;;  %v2141_v12 = vmul.f32 %v2825_v41, %v1744_v58  ;;  %v2133_v59 = vsel %vm2132_vm10, %v2821_v57, %v2129_v10  ;;  %vm2146_vm12 = vweird.f32 %v2825_v41 }
 0x326   : > { %2828 = vrcp.f32 %v1745_v6  ;;  %v3586_v17 = vsel %vm2135_vm11, %v2137_v15, %v2133_v59  ;;  %vm2147_vm15 = vmor %vm2145_vm13, %vm2146_vm12  ;;  %v2166_v14 = vand.u32 2147483648, %v1745_v6  ;;  %v2164_v38 = vand.u32 2147483647, %v1745_v6 }
 0x327   : > { %v2142_v16 = vsub.f32 1.0, %v2141_v12  ;;  %2309 = vst [vmem:[%s3439_s11 + $0xc8] sm:$0xff] %v3586_v17  ;;  %vm2160_vm3 = vweird.f32 %v1745_v6 }
 0x328   : > { %v1614_v22 = vpop.f32.mrf.mxu3  ;;  %v2167_v50 = vor.u32 1.1754944e-38, %v2166_v14  ;;  %vm2165_vm5 = vcmp.eq.f32.partialorder %v2164_v38, 8.507059e+37 }
 0x329   : > { %v1615_v18 = vadd.f32 %v3551_v27, %v1614_v22  ;;  %v2143_v19 = vmul.f32 %v2825_v41, %v2142_v16 }
 0x32b   : > { %v2827_v21 = vpop.eup %2826  ;;  %v2633_v23 = vmul.f32 -1.442695, %v1615_v18  ;;  %v2144_v26 = vadd.f32 %v2825_v41, %v2143_v19 }
 0x32c   : > { %v2829_v4 = vpop.eup %2828  ;;  %v1746_v30 = vadd.f32 1.0, %v2827_v21 }
 0x32d   : > { %2830 = vpow2.f32 %v2633_v23  ;;  %v2156_v33 = vmul.f32 %v2829_v4, %v1745_v6  ;;  %v2148_v31 = vsel %vm2147_vm15, %v2825_v41, %v2144_v26  ;;  %vm2161_vm1 = vweird.f32 %v2829_v4 }
 0x32e   : > { %2832 = vrcp.f32 %v1746_v30  ;;  %v3591_v35 = vsel %vm2150_vm0, %v2152_v32, %v2148_v31  ;;  %vm2162_vm4 = vmor %vm2160_vm3, %vm2161_vm1  ;;  %v2181_v58 = vand.u32 2147483648, %v1746_v30  ;;  %v2179_v60 = vand.u32 2147483647, %v1746_v30 }
 0x32f   : > { %v2157_v34 = vsub.f32 1.0, %v2156_v33  ;;  %2310 = vst [vmem:[%s3439_s11 + $0xd0] sm:$0xff] %v3591_v35  ;;  %vm2175_vm2 = vweird.f32 %v1746_v30 }
 0x330   : > { %v1617_v47 = vpop.f32.mrf.mxu3  ;;  %v2182_v28 = vor.u32 1.1754944e-38, %v2181_v58  ;;  %vm2180_vm7 = vcmp.eq.f32.partialorder %v2179_v60, 8.507059e+37 }
 0x331   : > { %v1618_v36 = vadd.f32 %v3551_v27, %v1617_v47  ;;  %v2158_v37 = vmul.f32 %v2829_v4, %v2157_v34 }
 0x333   : > { %v2831_v39 = vpop.eup %2830  ;;  %v2634_v11 = vmul.f32 -1.442695, %v1618_v36  ;;  %v2159_v42 = vadd.f32 %v2829_v4, %v2158_v37 }
 0x334   : > { %v2833_v43 = vpop.eup %2832  ;;  %v1747_v45 = vadd.f32 1.0, %v2831_v39 }
 0x335   : > { %2834 = vpow2.f32 %v2634_v11  ;;  %v2171_v46 = vmul.f32 %v2833_v43, %v1746_v30  ;;  %v2163_v49 = vsel %vm2162_vm4, %v2829_v4, %v2159_v42  ;;  %vm2176_vm14 = vweird.f32 %v2833_v43  ;;  %v2230_v42 = vld [vmem:[%s3677_s7] sm:$0x1] }
 0x336   : > { %2836 = vrcp.f32 %v1747_v45  ;;  %v3596_v52 = vsel %vm2165_vm5, %v2167_v50, %v2163_v49  ;;  %vm2177_vm6 = vmor %vm2175_vm2, %vm2176_vm14  ;;  %v2196_v10 = vand.u32 2147483648, %v1747_v45  ;;  %v2194_v41 = vand.u32 2147483647, %v1747_v45  ;;  %2249 = vmatmul.f32.vlgmr.msrb.gmra.mxu1 %v2230_v42 }
 0x337   : > { %v2172_v5 = vsub.f32 1.0, %v2171_v46  ;;  %2311 = vst [vmem:[%s3439_s11 + $0xd8] sm:$0xff] %v3596_v52  ;;  %vm2190_vm9 = vweird.f32 %v1747_v45 }
 0x338   : > { %v1619_v53 = vpop.f32.mrf.mxu3  ;;  %v2197_v18 = vor.u32 1.1754944e-38, %v2196_v10  ;;  %vm2195_vm11 = vcmp.eq.f32.partialorder %v2194_v41, 8.507059e+37 }
 0x339   : > { %v1620_v56 = vadd.f32 %v3551_v27, %v1619_v53  ;;  %v2173_v57 = vmul.f32 %v2833_v43, %v2172_v5 }
 0x33b   : > { %v2835_v25 = vpop.eup %2834  ;;  %v2635_v48 = vmul.f32 -1.442695, %v1620_v56  ;;  %v2174_v0 = vadd.f32 %v2833_v43, %v2173_v57 }
 0x33c   : > { %v2837_v61 = vpop.eup %2836  ;;  %v1748_v2 = vadd.f32 1.0, %v2835_v25 }
 0x33d   : > { %2838 = vpow2.f32 %v2635_v48  ;;  %v2186_v3 = vmul.f32 %v2837_v61, %v1747_v45  ;;  %v2178_v62 = vsel %vm2177_vm6, %v2833_v43, %v2174_v0  ;;  %vm2191_vm8 = vweird.f32 %v2837_v61 }
 0x33e   : > { %2840 = vrcp.f32 %v1748_v2  ;;  %v2183_v27 = vsel %vm2180_vm7, %v2182_v28, %v2178_v62  ;;  %vm2192_vm10 = vmor %vm2190_vm9, %vm2191_vm8  ;;  %v2211_v20 = vand.u32 2147483648, %v1748_v2  ;;  %v2209_v23 = vand.u32 2147483647, %v1748_v2 }
 0x33f   : > { %v2187_v7 = vsub.f32 1.0, %v2186_v3  ;;  %2312 = vst [vmem:[%s3439_s11 + $0xe0] sm:$0xff] %v2183_v27  ;;  %vm2205_vm13 = vweird.f32 %v1748_v2 }
 0x340   : > { %v2212_v30 = vor.u32 1.1754944e-38, %v2211_v20  ;;  %vm2210_vm0 = vcmp.eq.f32.partialorder %v2209_v23, 8.507059e+37 }
 0x341   : > { %v2188_v8 = vmul.f32 %v2837_v61, %v2187_v7 }
 0x343   : > { %v2839_v6 = vpop.eup %2838  ;;  %v2189_v12 = vadd.f32 %v2837_v61, %v2188_v8 }
 0x344   : > { %v2841_v59 = vpop.eup %2840  ;;  %v1749_v15 = vadd.f32 1.0, %v2839_v6 }
 0x345   : > { %v2201_v16 = vmul.f32 %v2841_v59, %v1748_v2  ;;  %v2193_v22 = vsel %vm2192_vm10, %v2837_v61, %v2189_v12  ;;  %vm2206_vm12 = vweird.f32 %v2841_v59 }
 0x346   : > { %2842 = vrcp.f32 %v1749_v15  ;;  %v2198_v51 = vsel %vm2195_vm11, %v2197_v18, %v2193_v22  ;;  %vm2207_vm15 = vmor %vm2205_vm13, %vm2206_vm12  ;;  %v2226_v47 = vand.u32 2147483648, %v1749_v15  ;;  %v2224_v37 = vand.u32 2147483647, %v1749_v15 }
 0x347   : > { %v2202_v19 = vsub.f32 1.0, %v2201_v16  ;;  %2313 = vst [vmem:[%s3439_s11 + $0xe8] sm:$0xff] %v2198_v51  ;;  %vm2220_vm3 = vweird.f32 %v1749_v15 }
 0x348   : > { %v2227_v38 = vor.u32 1.1754944e-38, %v2226_v47  ;;  %vm2225_vm5 = vcmp.eq.f32.partialorder %v2224_v37, 8.507059e+37 }
 0x349   : > { %v2203_v21 = vmul.f32 %v2841_v59, %v2202_v19 }
 0x34b   : > { %v2204_v26 = vadd.f32 %v2841_v59, %v2203_v21 }
 0x34c   : > { %v2843_v4 = vpop.eup %2842 }
 0x34d   : > { %v2216_v33 = vmul.f32 %v2843_v4, %v1749_v15  ;;  %v2208_v31 = vsel %vm2207_vm15, %v2841_v59, %v2204_v26  ;;  %vm2221_vm1 = vweird.f32 %v2843_v4 }
 0x34e   : > { %v2213_v32 = vsel %vm2210_vm0, %v2212_v30, %v2208_v31  ;;  %vm2222_vm4 = vmor %vm2220_vm3, %vm2221_vm1 }
 0x34f   : > { %v2217_v34 = vsub.f32 1.0, %v2216_v33  ;;  %2314 = vst [vmem:[%s3439_s11 + $0xf0] sm:$0xff] %v2213_v32 }
 0x351   : > { %v2218_v36 = vmul.f32 %v2843_v4, %v2217_v34 }
 0x353   : > { %v2219_v14 = vadd.f32 %v2843_v4, %v2218_v36 }
 0x355   : > { %v2223_v39 = vsel %vm2222_vm4, %v2843_v4, %v2219_v14 }
 0x356   : > { %v2228_v11 = vsel %vm2225_vm5, %v2227_v38, %v2223_v39 }
 0x357   : > { %2253 = vmatpush.xpose.msrb.mxu2 %v2228_v11  ;;  %2315 = vst [vmem:[%s3439_s11 + $0xf8] sm:$0xff] %v2228_v11 }
 0x35b   : > { %2254 = vmatpush.xpose.msrb.mxu2 %v2213_v32 }
 0x35f   : > { %2255 = vmatpush.xpose.msrb.mxu2 %v2198_v51 }
 0x363   : > { %2256 = vmatpush.xpose.msrb.mxu2 %v2183_v27 }
 0x367   : > { %2257 = vmatpush.xpose.msrb.mxu2 %v3596_v52 }
 0x36b   : > { %2258 = vmatpush.xpose.msrb.mxu2 %v3591_v35 }
 0x36f   : > { %2259 = vmatpush.xpose.msrb.mxu2 %v3586_v17 }
 0x373   : > { %2260 = vmatpush.xpose.msrb.mxu2 %v3581_v1 }
 0x377   : > { %2261 = vmatpush.xpose.msrb.mxu2 %v3576_v44 }
 0x37b   : > { %2262 = vmatpush.xpose.msrb.mxu2 %v3570_v29 }
 0x37f   : > { %2263 = vmatpush.xpose.msrb.mxu2 %v3563_v13 }
 0x383   : > { %2264 = vmatpush.xpose.msrb.mxu2 %v3556_v63 }
 0x387   : > { %2265 = vmatpush.xpose.msrb.mxu2 %v3544_v40 }
 0x38b   : > { %2266 = vmatpush.xpose.msrb.mxu2 %v3537_v24 }
 0x38f   : > { %2267 = vmatpush.xpose.msrb.mxu2 %v3530_v9 }
 0x393   : > { %2268 = vmatpush.xpose.msrb.mxu2 %v3523_v54 }
 0x396   : > { %2269 = vmatmul.f32.vlgmr.msrb.gmra.mxu2 %v2230_v42 }
 0x397   : > { %2873 = shalt.err (!%p2870_p3)
}
 0x398   : > { %s2945_s22 = smov 128   ;;  %s2946_s27 = smov 8   ;;  %vm2276_vm14 = vcmask 1040384   ;;  %vm2281_vm2 = vcmp.lt.s32.totalorder %v461_v55, 256 }
 0x399   : > { %2663 = dma.vmem_to_hbm [thread:$0]  (%p3043_p5), %s2349_s26, 4096, %s2351_s13, %s2322_s12, %s2945_s22, %s2945_s22, %s2946_s27  }
 0x39a   : > { %s2231_s28 = sld [smem:[#allocation2]]  ;;  %s2462_s29 = sshll.u32 %s3435_s30, 1 }
 0x39b   : > { %s2638_s3 = sshll.u32 %s3026_s8, 1  ;;  %s374_s14 = scalar_lea.vmem [#allocation3], %s2462_s29 }
 0x39c   : > { %s2332_s1 = scalar_lea.hbm %s3679_s9, %s2638_s3  ;;  %s2334_s19 = sshll.u32 %s374_s14, 4  ;;  %s2335_s19 = int_to_ptr.vmem [resolvable:$true] %s2334_s19 }
 0x39d   : > { %s2336_s21 = sshll.u32 %s2332_s1, 4  ;;  %s2317_s8 = scalar_lea.sflag [#allocation4], %s3435_s30  ;;  %s2337_s21 = int_to_ptr.hbm [resolvable:$true] %s2336_s21 }
 0x39e   : > { %s2888_s26 = sshra.s32 %s2337_s21, 4  ;;  %s2894_s11 = scalar_lea.hbm %s3679_s9, 4  ;;  %s2889_s26 = int_to_ptr.hbm [resolvable:$true] %s2888_s26 }
 0x39f   : > { %s2890_s13 = scalar_lea.hbm %s2889_s26, 2  ;;  %p2895_p9 = scmp.lt.s32.totalorder %s2889_s26, %s3679_s9 }
 0x3a0   : > { %v2232_v54 = vstv %s2231_s28  ;;  %p2891_p4 = scmp.ne.s32.totalorder %s2889_s26, %s2890_s13  ;;  %p2896_p10 = scmp.lt.s32.totalorder %s2894_s11, %s2890_s13 }
 0x3a2   : > { %p2892_p7 = pnand %p2891_p4, %p3043_p5  ;;  %p2897_p11 = por %p2896_p10, %p2895_p9 }
 0x3a4   : > { %p2893_p8 = pneg %p2892_p7 }
 0x3a6   : > { %p2898_p12 = pnand %p2897_p11, %p2893_p8 }
 0x3b3   : > { %v2250_v9 = vpop.f32.mrf.mxu1 }
 0x3b4   : > { %v2251_v63 = vadd.f32 %v2250_v9, %v2232_v54 }
 0x419   : > { %v2270_v24 = vpop.f32.mrf.mxu2 }
 0x41a   : > { %v2271_v40 = vadd.f32 %v2270_v24, %v2232_v54 }
 0x41c   : > { %v2275_v13 = vrot.slane %v2271_v40, 7 }
 0x41e   : > { %v2277_v29 = vsel %vm2276_vm14, %v2251_v63, %v2275_v13 }
 0x41f   : > { %2283 = vst.msk [vmem:[%s374_s14] sm:$0x3] %vm2281_vm2, %v2277_v29 }
 0x420   : > { %2901 = shalt.err (!%p2898_p12)
}
 0x421   : > { %2662 = dma.vmem_to_hbm [thread:$0]  (%p3043_p5), %s2335_s19, 32, %s2337_s21, %s2317_s8  }
 0x422 PF: > { %p2673_p13 = scmp.ge.s32.totalorder %s2940_s18, 2  ;;  %s2365_s30 = sand.u32 1, %s2928_s15  }
 0x423   : > { %s2366_s28 = scalar_lea.sflag [#allocation4], %s2365_s30 }
 0x424   : > { %p2667_p0 = pnand %p2673_p13, %p3047_p6 }
 0x426   : > { %p2668_p1 = pneg %p2667_p0 }
 0x428   : > { %2919 = dma.done.wait (%p2668_p1), %s2366_s28, 32  }
 0x429   : > { %2921 = vsyncadd (%p2668_p1), %s2366_s28, 4294967264  ;;  %s2376_s29 = scalar_lea.sflag [#allocation6], %s2365_s30 }
 0x42a   : > { %2923 = dma.done.wait (%p2668_p1), %s2376_s29, 4096  }
 0x42b   : > { %2925 = vsyncadd (%p2668_p1), %s2376_s29, 4294963200  ;;  %p25_p5 = scmp.ge.s32.totalorder %s3030_s20, 4   ;;  %s3691_s15 = smov %s2932_s16 }
 0x42c   : > { %s3692_s16 = smov %s2936_s17  ;;  %s3693_s17 = smov %s3041_s23 }
 0x42d   : > { %s3694_s18 = smov %s3030_s20  ;;  %27 = sbr.rel (!%p25_p5) target bundleno = 11 (0xb), region = 111 }
 0x432   :  { %2382 = vsyncpa [#allocation4], 1 }
 0x433   :  { %2384 = vsyncpa [#allocation4 + $0x1], 1 }
 0x434   :  { %2385 = vsyncpa [#allocation6], 1 }
 0x435   :  { %2387 = vsyncpa [#allocation6 + $0x1], 1 }

</bundles_post_ra>
